<compile_context>
chip_gen: v6e
topology: v6e:2x2x1
jax: 0.10.0
libtpu: 0.0.40
codegen_flags: <defaults>
</compile_context>

<pallas_src>
import jax
import jax.numpy as jnp
import numpy as np
from jax.experimental import pallas as pl
from jax.experimental.pallas import tpu as pltpu

INPUT_SIZE = 768
HIDDEN_SIZE = 256
OUTPUT_SIZE = 3
OUT_PAD = 128  # lane-dense padded output width


def mlp_kernel(x_ref, w1_ref, b1_ref, w2_ref, b2_ref, o_ref):
    # Fused hot path: bf16 matmul (fp32 acc) -> bias -> ReLU -> bf16 matmul
    # (fp32 acc) -> bias.  Biases stay f32 and are added post-accumulation.
    x = x_ref[...]                                   # bf16 [tm, 768]
    h = jnp.dot(x, w1_ref[...], preferred_element_type=jnp.float32) + b1_ref[...]
    h = jnp.maximum(h, 0.0)
    # TODO(synk): Dropout(0.2) is identity at inference; training-mode stochastic
    # masking (pltpu.prng_seed / prng_random_bits) intentionally omitted.
    h = h.astype(w2_ref.dtype)                       # back to bf16 for the MXU
    out = jnp.dot(h, w2_ref[...], preferred_element_type=jnp.float32) + b2_ref[...]
    o_ref[...] = out.astype(o_ref.dtype)             # [tm, 128] lane-dense store


def unstructured_classifier(x, w1, b1, w2, b2, *, batch_tile=256):
    """Eval-mode forward of UnstructuredClassifier. x: [B, 768] -> [B, 3]."""
    B, IN = x.shape
    HID = w1.shape[1]
    OUT = w2.shape[1]
    assert batch_tile % 16 == 0, "bf16 sublane tiling wants batch_tile % 16 == 0"

    # bf16 activations/weights, f32 biases (added after the f32 accumulate).
    x_bf = x.astype(jnp.bfloat16)
    w1_bf = w1.astype(jnp.bfloat16)
    b1_f = b1.astype(jnp.float32).reshape(1, HID)

    # Pad W2/b2 to a 128-wide lane-dense output; extra columns are exact zeros.
    w2_p = jnp.zeros((HID, OUT_PAD), jnp.bfloat16).at[:, :OUT].set(
        w2.astype(jnp.bfloat16))
    b2_p = jnp.zeros((1, OUT_PAD), jnp.float32).at[:, :OUT].set(
        b2.astype(jnp.float32).reshape(1, OUT))

    # Pad the batch to a multiple of batch_tile (padded rows are discarded).
    B_pad = pl.cdiv(B, batch_tile) * batch_tile
    if B_pad != B:
        x_bf = jnp.zeros((B_pad, IN), jnp.bfloat16).at[:B, :].set(x_bf)

    grid = (B_pad // batch_tile,)
    out = pl.pallas_call(
        mlp_kernel,
        out_shape=jax.ShapeDtypeStruct((B_pad, OUT_PAD), jnp.float32),
        grid=grid,
        in_specs=[
            pl.BlockSpec((batch_tile, IN), lambda i: (i, 0)),   # x tile
            pl.BlockSpec((IN, HID), lambda i: (0, 0)),          # W1 (resident; constant index -> no re-DMA)
            pl.BlockSpec((1, HID), lambda i: (0, 0)),           # b1
            pl.BlockSpec((HID, OUT_PAD), lambda i: (0, 0)),     # W2 padded to 128 lanes
            pl.BlockSpec((1, OUT_PAD), lambda i: (0, 0)),       # b2 padded
        ],
        out_specs=pl.BlockSpec((batch_tile, OUT_PAD), lambda i: (i, 0)),
        compiler_params=pltpu.CompilerParams(
            dimension_semantics=("parallel",),   # lets v7x shard grid steps across its 2 TCs
        ),
    )(x_bf, w1_bf, b1_f, w2_p, b2_p)

    return out[:B, :OUT]


def init_params(key):
    # Deterministic synthetic parameters (PyTorch-like uniform fan-in init), f32 master copy.
    k1, k2, k3, k4 = jax.random.split(key, 4)
    lim1 = 1.0 / np.sqrt(INPUT_SIZE)
    lim2 = 1.0 / np.sqrt(HIDDEN_SIZE)
    w1 = jax.random.uniform(k1, (INPUT_SIZE, HIDDEN_SIZE), jnp.float32, -lim1, lim1)
    b1 = jax.random.uniform(k2, (1, HIDDEN_SIZE), jnp.float32, -lim1, lim1)
    w2 = jax.random.uniform(k3, (HIDDEN_SIZE, OUTPUT_SIZE), jnp.float32, -lim2, lim2)
    b2 = jax.random.uniform(k4, (1, OUTPUT_SIZE), jnp.float32, -lim2, lim2)
    return w1, b1, w2, b2


if __name__ == "__main__":
    key = jax.random.PRNGKey(0)
    kx, kp = jax.random.split(key)

    # Batch of pooled CLS embeddings (size 768).  512 rows -> grid of 2 tiles of 256,
    # so both v7x TensorCores get work and the MXU sees full-height tiles.
    batch = 512
    x = jax.random.normal(kx, (batch, INPUT_SIZE), jnp.float32)
    w1, b1, w2, b2 = init_params(kp)

    out = unstructured_classifier(x, w1, b1, w2, b2, batch_tile=256)
    out = jax.block_until_ready(out)

    # Pure-JAX f32 reference (eval-mode forward); tolerance loosened for bf16 weights.
    ref = jnp.maximum(x @ w1 + b1, 0.0) @ w2 + b2
    np.testing.assert_allclose(np.asarray(out), np.asarray(ref), rtol=2e-2, atol=2e-2)

    assert out.shape == (batch, OUTPUT_SIZE)
    print("KERNEL_OK")
</pallas_src>

<mosaic_0001>
module attributes {stable_mosaic.version = 11 : i64} {
  func.func @mlp_kernel(%arg0: i32, %arg1: memref<256x768xbf16, #tpu.memory_space<vmem>>, %arg2: memref<768x256xbf16, #tpu.memory_space<vmem>>, %arg3: memref<1x256xf32, #tpu.memory_space<vmem>>, %arg4: memref<256x128xbf16, #tpu.memory_space<vmem>>, %arg5: memref<1x128xf32, #tpu.memory_space<vmem>>, %arg6: memref<256x128xf32, #tpu.memory_space<vmem>>) attributes {dimension_semantics = [#tpu.dimension_semantics<parallel>], iteration_bounds = array<i64: 2>, scalar_prefetch = 0 : i64, scratch_operands = 0 : i64, tpu.core_type = #tpu.core_type<tc>, window_params = [{transform_indices = @transform_0, window_bounds = array<i64: 256, 768>}, {pipeline_mode = #tpu.pipeline_mode<synchronous>, transform_indices = @transform_1, window_bounds = array<i64: 768, 256>}, {pipeline_mode = #tpu.pipeline_mode<synchronous>, transform_indices = @transform_2, window_bounds = array<i64: 1, 256>}, {pipeline_mode = #tpu.pipeline_mode<synchronous>, transform_indices = @transform_3, window_bounds = array<i64: 256, 128>}, {pipeline_mode = #tpu.pipeline_mode<synchronous>, transform_indices = @transform_4, window_bounds = array<i64: 1, 128>}, {transform_indices = @transform_5, window_bounds = array<i64: 256, 128>}]} {
    %c0 = arith.constant 0 : index
    %c0_0 = arith.constant 0 : index
    %0 = vector.load %arg1[%c0, %c0_0] : memref<256x768xbf16, #tpu.memory_space<vmem>>, vector<256x768xbf16>
    %c0_1 = arith.constant 0 : index
    %c0_2 = arith.constant 0 : index
    %1 = vector.load %arg2[%c0_1, %c0_2] : memref<768x256xbf16, #tpu.memory_space<vmem>>, vector<768x256xbf16>
    %cst = arith.constant dense<0.000000e+00> : vector<256x256xf32>
    %2 = tpu.matmul %0, %1, %cst {dimension_numbers = #tpu.dot_dimension_numbers<[1], [0], [0], [1], [0, 0, 1, 1], [], []>} : vector<256x768xbf16>, vector<768x256xbf16>, vector<256x256xf32> -> vector<256x256xf32>
    %c0_3 = arith.constant 0 : index
    %c0_4 = arith.constant 0 : index
    %3 = vector.load %arg3[%c0_3, %c0_4] : memref<1x256xf32, #tpu.memory_space<vmem>>, vector<1x256xf32>
    %4 = vector.broadcast %3 : vector<1x256xf32> to vector<256x256xf32>
    %5 = arith.addf %2, %4 : vector<256x256xf32>
    %cst_5 = arith.constant 0.000000e+00 : f32
    %6 = vector.broadcast %cst_5 : f32 to vector<256x256xf32>
    %7 = arith.maximumf %5, %6 : vector<256x256xf32>
    %8 = arith.truncf %7 : vector<256x256xf32> to vector<256x256xbf16>
    %c0_6 = arith.constant 0 : index
    %c0_7 = arith.constant 0 : index
    %9 = vector.load %arg4[%c0_6, %c0_7] : memref<256x128xbf16, #tpu.memory_space<vmem>>, vector<256x128xbf16>
    %cst_8 = arith.constant dense<0.000000e+00> : vector<256x128xf32>
    %10 = tpu.matmul %8, %9, %cst_8 {dimension_numbers = #tpu.dot_dimension_numbers<[1], [0], [0], [1], [0, 0, 1, 1], [], []>} : vector<256x256xbf16>, vector<256x128xbf16>, vector<256x128xf32> -> vector<256x128xf32>
    %c0_9 = arith.constant 0 : index
    %c0_10 = arith.constant 0 : index
    %11 = vector.load %arg5[%c0_9, %c0_10] : memref<1x128xf32, #tpu.memory_space<vmem>>, vector<1x128xf32>
    %12 = vector.broadcast %11 : vector<1x128xf32> to vector<256x128xf32>
    %13 = arith.addf %10, %12 : vector<256x128xf32>
    %c0_11 = arith.constant 0 : index
    %c0_12 = arith.constant 0 : index
    %14 = vector.load %arg6[%c0_11, %c0_12] : memref<256x128xf32, #tpu.memory_space<vmem>>, vector<256x128xf32>
    tpu.vector_store %arg6[%c0_11, %c0_12], %13 {strides = array<i32>} : memref<256x128xf32, #tpu.memory_space<vmem>>, vector<256x128xf32>,
    return
  }
  func.func @transform_0(%arg0: i32) -> (i32, i32) {
    %c0_i32 = arith.constant 0 : i32
    %c0_i32_0 = arith.constant 0 : i32
    return %arg0, %c0_i32 : i32, i32
  }
  func.func @transform_1(%arg0: i32) -> (i32, i32) {
    %c0_i32 = arith.constant 0 : i32
    %c0_i32_0 = arith.constant 0 : i32
    %c0_i32_1 = arith.constant 0 : i32
    return %c0_i32, %c0_i32_0 : i32, i32
  }
  func.func @transform_2(%arg0: i32) -> (i32, i32) {
    %c0_i32 = arith.constant 0 : i32
    %c0_i32_0 = arith.constant 0 : i32
    %c0_i32_1 = arith.constant 0 : i32
    return %c0_i32, %c0_i32_0 : i32, i32
  }
  func.func @transform_3(%arg0: i32) -> (i32, i32) {
    %c0_i32 = arith.constant 0 : i32
    %c0_i32_0 = arith.constant 0 : i32
    %c0_i32_1 = arith.constant 0 : i32
    return %c0_i32, %c0_i32_0 : i32, i32
  }
  func.func @transform_4(%arg0: i32) -> (i32, i32) {
    %c0_i32 = arith.constant 0 : i32
    %c0_i32_0 = arith.constant 0 : i32
    %c0_i32_1 = arith.constant 0 : i32
    return %c0_i32, %c0_i32_0 : i32, i32
  }
  func.func @transform_5(%arg0: i32) -> (i32, i32) {
    %c0_i32 = arith.constant 0 : i32
    %c0_i32_0 = arith.constant 0 : i32
    return %arg0, %c0_i32 : i32, i32
  }
}

</mosaic_0001>

<bundles_post_ra>
// kernel: tpu_custom_call.1
= control target key start
LH: loop header
LB: loop body
LE: loop exit
PB: predicated region body
PF: predicated region fallthrough
CT: control target
= control target key end

     0   :  { %10 = vsyncpa [#allocation3], 0  ;;  %s4249_s0 = inlined_call_operand.hbm [shape: bf16[512,768], index: 0, kind: input, shape index: {}]   ;;  %s4250_s1 = inlined_call_operand.hbm [shape: bf16[768,256], index: 1, kind: input, shape index: {}]   ;;  %s4251_s2 = inlined_call_operand.vmem [shape: f32[1,256], index: 2, kind: input, shape index: {}]   ;;  %s4252_s3 = inlined_call_operand.hbm [shape: bf16[256,128], index: 3, kind: input, shape index: {}]   ;;  %s4253_s4 = inlined_call_operand.vmem [shape: f32[1,128], index: 4, kind: input, shape index: {}]   ;;  %s4254_s5 = inlined_call_operand.hbm [shape: f32[512,128], index: 5, kind: output, shape index: {}]  }
   0x1   :  { %12 = vsyncpa [#allocation3 + $0x1], 0 }
   0x2   :  { %13 = vsyncpa [#allocation6], 0 }
   0x3   :  { %14 = vsyncpa [#allocation4], 0 }
   0x4   :  { %16 = vsyncpa [#allocation4 + $0x1], 0  ;;  %s3462_s18 = smov 0   ;;  %s3464_s19 = smov 0  }
   0x5   :  { %s3466_s20 = smov 0   ;;  %s3468_s21 = smov 0  }
   0x6 LB: > { %s3483_s22 = sadd.s32 4294967295, %s3418_s21   ;;  %s2549_s23 = sadd.s32 4294967294, %s3418_s21   ;;  %s3418_s21 = sphi %s3468_s21, %s4372_s21   ;;  %s3414_s20 = sphi %s3466_s20, %s4371_s20   ;;  %s3410_s19 = sphi %s3464_s19, %s4370_s19   ;;  %s3406_s18 = sphi %s3462_s18, %s4369_s18  }
   0x7   : > { %p42_p0 = scmp.ne.s32.totalorder %s3410_s19, %s3406_s18  ;;  %p4255_p1 = scmp.eq.s32.totalorder %s3483_s22, 0 }
   0x8   : > { %p156_p3 = scmp.eq.s32.totalorder %s2549_s23, 1  ;;  %p2550_p5 = scmp.ge.s32.totalorder %s3418_s21, 1 }
   0x9   : > { %p3492_p4 = por %p4255_p1, %p42_p0  ;;  %p163_p7 = scmp.lt.s32.totalorder %s3418_s21, 3 }
   0xa   : > { %p3497_p6 = por %p156_p3, %p42_p0  ;;  %s3420_s27 = smov [#allocation5]  }
   0xb   : > { %s4259_s24 = scalar_select %p3492_p4, 1, 0 }
   0xc   : > { %s4260_s25 = scalar_select %p3497_p6, 1, 0 }
   0xd   : > { %p3502_p8 = pnand %p2550_p5, %p163_p7  ;;  %s175_s28 = sshll.u32 %s3420_s27, 4  ;;  %s176_s28 = int_to_ptr.vmem [resolvable:$true] %s175_s28 }
   0xe   : > { %s3421_s30 = smov [#allocation7]   ;;  %s3281_s7 = scalar_lea.vmem %s176_s28, 12288 }
   0xf   : > { %s4261_s26 = scalar_select %p3502_p8, 1, 0 }
  0x10   : > { %p2903_p9 = pneg %p3502_p8  ;;  %s191_s6 = sshll.u32 %s3421_s30, 4  ;;  %s192_s6 = int_to_ptr.vmem [resolvable:$true] %s191_s6 }
  0x11   : > { %p3282_p13 = scmp.ne.s32.totalorder %s176_s28, %s3281_s7  ;;  %p3289_p5 = scmp.lt.s32.totalorder %s176_s28, %s176_s28 }
  0x12   : > { %p3511_p11 = pnand %p2903_p9, %p4255_p1  ;;  %p3290_p7 = scmp.lt.s32.totalorder %s3281_s7, %s3281_s7 }
  0x14   : > { %p3272_p12 = pneg %p3511_p11  ;;  %p3291_p10 = por %p3290_p7, %p3289_p5 }
  0x16   : > { %p3284_p0 = pnand %p3282_p13, %p3272_p12 }
  0x18   : > { %p3285_p3 = pneg %p3284_p0 }
  0x1a   : > { %p3292_p9 = pnand %p3291_p10, %p3285_p3 }
  0x1c   : > { %3295 = shalt.err (!%p3292_p9)
}
  0x1d   : > { %s3422_s8 = smov 128   ;;  %s3423_s9 = smov 8  }
  0x1e   : > { %2906 = dma.hbm_to_vmem [thread:$0]  (!%p3511_p11), %s4250_s1, 12288, %s176_s28, [#allocation6], %s3422_s8, %s3422_s8, %s3423_s9  }
  0x1f   : > { %s3307_s12 = scalar_lea.vmem %s192_s6, 2048  ;;  %p3315_p2 = scmp.lt.s32.totalorder %s192_s6, %s192_s6 }
  0x20   : > { %p3308_p1 = scmp.ne.s32.totalorder %s192_s6, %s3307_s12  ;;  %p3316_p6 = scmp.lt.s32.totalorder %s3307_s12, %s3307_s12 }
  0x22   : > { %p3310_p13 = pnand %p3308_p1, %p3272_p12  ;;  %p3317_p5 = por %p3316_p6, %p3315_p2 }
  0x24   : > { %p3311_p0 = pneg %p3310_p13 }
  0x26   : > { %p3318_p10 = pnand %p3317_p5, %p3311_p0 }
  0x28   : > { %3321 = shalt.err (!%p3318_p10)
}
  0x29   : > { %s3424_s13 = smov 64   ;;  %s3425_s14 = smov 4  }
  0x2a   : > { %2909 = dma.hbm_to_vmem [thread:$0]  (!%p3511_p11), %s4252_s3, 2048, %s192_s6, [#allocation6], %s3424_s13, %s3424_s13, %s3425_s14  }
  0x2b   : > { %s3534_s17 = sadd.s32 1, %s3418_s21   ;;  %s29_s27 = sadd.s32 1, %s3414_s20 }
  0x2c   : > { %s26_s23 = ssub.s32 %s3418_s21, %s3534_s17  ;;  %p36_p2 = scmp.ne.s32.totalorder %s3414_s20, %s3410_s19 }
  0x2d   : > { %p27_p1 = scmp.eq.s32.totalorder %s26_s23, 0  ;;  %p37_p6 = scmp.eq.s32.totalorder %s3418_s21, 0 }
  0x2e   : > { %p4263_p3 = scmp.eq.s32.totalorder %s3483_s22, 1  ;;  %p2920_p9 = scmp.lt.s32.totalorder %s3418_s21, 2 }
  0x2f   : > { %s3543_s28 = scalar_select %p27_p1, %s3414_s20, %s29_s27  }
  0x30   : > { %p38_p12 = por %p37_p6, %p36_p2  ;;  %p3547_p7 = por %p4263_p3, %p36_p2 }
  0x31   : > { %s208_s29 = sand.u32 1, %s3414_s20   ;;  %s2889_s6 = smul.u32 12288, %s3418_s21 }
  0x32   : > { %s4264_s30 = scalar_select %p3547_p7, 1, 0 }
  0x33   : > { %s2888_s7 = smul.u32 768, %s208_s29  ;;  %p3554_p11 = pnand %p2920_p9, %p38_p12 }
  0x34   : > { %s3561_s11 = scalar_lea.hbm %s4249_s0, %s2889_s6  ;;  %s3565_s14 = scalar_lea.sflag [#allocation3], %s208_s29 }
  0x35   : > { %s212_s12 = scalar_lea.vmem [#allocation2], %s2888_s7  ;;  %s3322_s15 = scalar_lea.hbm %s3561_s11, 12288 }
  0x36   : > { %s220_s13 = sshll.u32 %s212_s12, 4  ;;  %p3323_p13 = scmp.ne.s32.totalorder %s3561_s11, %s3322_s15  ;;  %s3563_s13 = int_to_ptr.vmem [resolvable:$true] %s220_s13 }
  0x37   : > { %p3324_p0 = pneg %p3554_p11  ;;  %s3327_s27 = scalar_lea.hbm %s4249_s0, 24576 }
  0x38   : > { %p3328_p1 = scmp.lt.s32.totalorder %s3561_s11, %s4249_s0  ;;  %p3329_p2 = scmp.lt.s32.totalorder %s3327_s27, %s3322_s15 }
  0x39   : > { %p3325_p5 = pnand %p3324_p0, %p3323_p13 }
  0x3a   : > { %p3330_p6 = por %p3329_p2, %p3328_p1 }
  0x3b   : > { %p3326_p10 = pneg %p3325_p5 }
  0x3d   : > { %p3331_p12 = pnand %p3330_p6, %p3326_p10 }
  0x3f   : > { %3334 = shalt.err (!%p3331_p12)
}
  0x40   : > { %s3335_s29 = scalar_lea.vmem %s3563_s13, 12288  ;;  %s3426_s7 = smov [#allocation2]  }
  0x41   : > { %p3336_p3 = scmp.ne.s32.totalorder %s3563_s13, %s3335_s29  ;;  %s3340_s10 = sshll.u32 %s3426_s7, 4  ;;  %s3341_s10 = int_to_ptr.vmem [resolvable:$false] %s3340_s10 }
  0x42   : > { %s3342_s12 = scalar_lea.vmem %s3341_s10, 24576  ;;  %p3343_p5 = scmp.lt.s32.totalorder %s3563_s13, %s3341_s10 }
  0x43   : > { %p3338_p9 = pnand %p3336_p3, %p3324_p0  ;;  %p3344_p7 = scmp.lt.s32.totalorder %s3342_s12, %s3335_s29 }
  0x45   : > { %p3339_p13 = pneg %p3338_p9  ;;  %p3345_p4 = por %p3344_p7, %p3343_p5 }
  0x47   : > { %p3346_p8 = pnand %p3345_p4, %p3339_p13 }
  0x49   : > { %3349 = shalt.err (!%p3346_p8)
}
  0x4a   : > { %s3427_s15 = smov 384   ;;  %s3428_s16 = smov 24  }
  0x4b   : > { %2913 = dma.hbm_to_vmem [thread:$0]  (!%p3554_p11), %s3561_s11, 12288, %s3563_s13, %s3565_s14, %s3427_s15, %s3427_s15, %s3428_s16  }
  0x4c   : > { %p4266_p0 = scmp.ne.s32.totalorder %s4261_s26, 0 }
  0x4e   : > { %232 = sbr.rel (%p4266_p0) target bundleno = 827 (0x33b), region = 40 }
  0x53   : > { %s3589_s23 = sand.u32 1, %s3410_s19   ;;  %p4267_p4 = scmp.ne.s32.totalorder %s4259_s24, 0 }
  0x54   : > { %s2890_s27 = smul.u32 768, %s3589_s23  ;;  %s235_s6 = scalar_lea.sflag [#allocation3], %s3589_s23 }
  0x56   : > { %s3593_s9 = scalar_lea.vmem [#allocation2], %s2890_s27 }
  0x57   : > { %3393 = dma.done.wait (%p4267_p4), %s235_s6, 12288  }
  0x58   : > { %3395 = vsyncadd (%p4267_p4), %s235_s6, 4294955008  ;;  %p4268_p8 = scmp.eq.s32.totalorder %s3483_s22, 0 }
  0x5a   : > { %3397 = dma.done.wait (%p4268_p8), [#allocation6], 14336   ;;  %p4269_p7 = pmov %p4268_p8 }
  0x5b   : > { %v2966_v0 = vld [vmem:[#allocation5 + $0x74] ss:$8 sps:$4 sm:$0xff]   ;;  %v2968_v1 = vld [vmem:[#allocation5 + $0x70] ss:$8 sps:$4 sm:$0xff]   ;;  %v2972_v4 = vld [vmem:[#allocation5 + $0x64] ss:$8 sps:$4 sm:$0xff]  }
  0x5c   : > { %3399 = vsyncadd (%p4269_p7), [#allocation6], 4294952960  ;;  %1440 = vmatprep.subr.bf16.mxu0 %v2966_v0  ;;  %v2969_v2 = vld [vmem:[#allocation5 + $0x174] ss:$8 sps:$4 sm:$0xff]   ;;  %v2971_v3 = vld [vmem:[#allocation5 + $0x170] ss:$8 sps:$4 sm:$0xff]  }
  0x5d   : > { %1441 = vmatpush1.bf16.msra.mxu0 %v2968_v1  ;;  %v2974_v5 = vld [vmem:[#allocation5 + $0x60] ss:$8 sps:$4 sm:$0xff]   ;;  %1633 = vmatprep.subr.bf16.mxu1 %v2969_v2  ;;  %v2975_v6 = vld [vmem:[#allocation5 + $0x164] ss:$8 sps:$4 sm:$0xff]   ;;  %v2978_v8 = vld [vmem:[#allocation5 + $0x54] ss:$8 sps:$4 sm:$0xff]  }
  0x5e   : > { %1634 = vmatpush1.bf16.msra.mxu1 %v2971_v3  ;;  %1442 = vmatprep.subr.bf16.mxu0 %v2972_v4  ;;  %v2977_v7 = vld [vmem:[#allocation5 + $0x160] ss:$8 sps:$4 sm:$0xff]   ;;  %v2980_v9 = vld [vmem:[#allocation5 + $0x50] ss:$8 sps:$4 sm:$0xff]   ;;  %v2981_v10 = vld [vmem:[#allocation5 + $0x154] ss:$8 sps:$4 sm:$0xff]  }
  0x5f   : > { %1635 = vmatprep.subr.bf16.mxu1 %v2975_v6  ;;  %v2984_v11 = vld [vmem:[#allocation5 + $0x44] ss:$8 sps:$4 sm:$0xff]   ;;  %v2983_v12 = vld [vmem:[#allocation5 + $0x150] ss:$8 sps:$4 sm:$0xff]   ;;  %v2986_v14 = vld [vmem:[#allocation5 + $0x40] ss:$8 sps:$4 sm:$0xff]  }
  0x60   : > { %v2987_v13 = vld [vmem:[#allocation5 + $0x144] ss:$8 sps:$4 sm:$0xff]   ;;  %v2990_v15 = vld [vmem:[#allocation5 + $0x34] ss:$8 sps:$4 sm:$0xff]   ;;  %v2989_v16 = vld [vmem:[#allocation5 + $0x140] ss:$8 sps:$4 sm:$0xff]  }
  0x61   : > { %1443 = vmatpush1.bf16.msra.mxu0 %v2974_v5  ;;  %v2993_v17 = vld [vmem:[#allocation5 + $0x134] ss:$8 sps:$4 sm:$0xff]   ;;  %v2992_v18 = vld [vmem:[#allocation5 + $0x30] ss:$8 sps:$4 sm:$0xff]   ;;  %v2996_v19 = vld [vmem:[#allocation5 + $0x24] ss:$8 sps:$4 sm:$0xff]  }
  0x62   : > { %1444 = vmatprep.subr.bf16.mxu0 %v2978_v8  ;;  %1636 = vmatpush1.bf16.msra.mxu1 %v2977_v7  ;;  %v2995_v20 = vld [vmem:[#allocation5 + $0x130] ss:$8 sps:$4 sm:$0xff]   ;;  %v2999_v21 = vld [vmem:[#allocation5 + $0x124] ss:$8 sps:$4 sm:$0xff]   ;;  %v2998_v22 = vld [vmem:[#allocation5 + $0x20] ss:$8 sps:$4 sm:$0xff]  }
  0x63   : > { %1637 = vmatprep.subr.bf16.mxu1 %v2981_v10  ;;  %v3002_v23 = vld [vmem:[#allocation5 + $0x14] ss:$8 sps:$4 sm:$0xff]   ;;  %v3001_v24 = vld [vmem:[#allocation5 + $0x120] ss:$8 sps:$4 sm:$0xff]   ;;  %v3004_v26 = vld [vmem:[#allocation5 + $0x10] ss:$8 sps:$4 sm:$0xff]  }
  0x64   : > { %v3005_v25 = vld [vmem:[#allocation5 + $0x114] ss:$8 sps:$4 sm:$0xff]   ;;  %v3008_v27 = vld [vmem:[#allocation5 + $0x4] ss:$8 sps:$4 sm:$0xff]   ;;  %v3007_v28 = vld [vmem:[#allocation5 + $0x110] ss:$8 sps:$4 sm:$0xff]  }
  0x65   : > { %1445 = vmatpush1.bf16.msra.mxu0 %v2980_v9  ;;  %v3011_v29 = vld [vmem:[#allocation5 + $0x104] ss:$8 sps:$4 sm:$0xff]   ;;  %v3010_v30 = vld [vmem:[#allocation5] ss:$8 sps:$4 sm:$0xff]   ;;  %v3014_v31 = vld [vmem:[#allocation5 + $0xf4] ss:$8 sps:$4 sm:$0xff]  }
  0x66   : > { %1446 = vmatprep.subr.bf16.mxu0 %v2984_v11  ;;  %1638 = vmatpush1.bf16.msra.mxu1 %v2983_v12  ;;  %v3013_v32 = vld [vmem:[#allocation5 + $0x100] ss:$8 sps:$4 sm:$0xff]   ;;  %v3017_v33 = vld [vmem:[#allocation5 + $0x1f4] ss:$8 sps:$4 sm:$0xff]   ;;  %v3016_v34 = vld [vmem:[#allocation5 + $0xf0] ss:$8 sps:$4 sm:$0xff]  }
  0x67   : > { %1639 = vmatprep.subr.bf16.mxu1 %v2987_v13  ;;  %v3020_v35 = vld [vmem:[#allocation5 + $0xe4] ss:$8 sps:$4 sm:$0xff]   ;;  %v3019_v36 = vld [vmem:[#allocation5 + $0x1f0] ss:$8 sps:$4 sm:$0xff]   ;;  %v3022_v38 = vld [vmem:[#allocation5 + $0xe0] ss:$8 sps:$4 sm:$0xff]  }
  0x68   : > { %v3023_v37 = vld [vmem:[#allocation5 + $0x1e4] ss:$8 sps:$4 sm:$0xff]   ;;  %v3026_v39 = vld [vmem:[#allocation5 + $0xd4] ss:$8 sps:$4 sm:$0xff]   ;;  %v3025_v40 = vld [vmem:[#allocation5 + $0x1e0] ss:$8 sps:$4 sm:$0xff]  }
  0x69   : > { %1447 = vmatpush1.bf16.msra.mxu0 %v2986_v14  ;;  %v3029_v41 = vld [vmem:[#allocation5 + $0x1d4] ss:$8 sps:$4 sm:$0xff]   ;;  %v3028_v42 = vld [vmem:[#allocation5 + $0xd0] ss:$8 sps:$4 sm:$0xff]   ;;  %v3032_v43 = vld [vmem:[#allocation5 + $0xc4] ss:$8 sps:$4 sm:$0xff]  }
  0x6a   : > { %1448 = vmatprep.subr.bf16.mxu0 %v2990_v15  ;;  %1640 = vmatpush1.bf16.msra.mxu1 %v2989_v16  ;;  %v3031_v44 = vld [vmem:[#allocation5 + $0x1d0] ss:$8 sps:$4 sm:$0xff]   ;;  %v3035_v45 = vld [vmem:[#allocation5 + $0x1c4] ss:$8 sps:$4 sm:$0xff]   ;;  %v3034_v46 = vld [vmem:[#allocation5 + $0xc0] ss:$8 sps:$4 sm:$0xff]  }
  0x6b   : > { %1641 = vmatprep.subr.bf16.mxu1 %v2993_v17  ;;  %v3063_v47 = vld [vmem:[%s3593_s9 + $0x4] ss:$24 sps:$4 sm:$0xff]   ;;  %v3037_v49 = vld [vmem:[#allocation5 + $0x1c0] ss:$8 sps:$4 sm:$0xff]   ;;  %v3040_v52 = vld [vmem:[#allocation5 + $0xb0] ss:$8 sps:$4 sm:$0xff]  }
  0x6c   : > { %v3038_v48 = vld [vmem:[#allocation5 + $0xb4] ss:$8 sps:$4 sm:$0xff]   ;;  %1472 = vmatprep.mubr.bf16.mxu0 %v3063_v47  ;;  %v3070_v51 = vld [vmem:[%s3593_s9 + $0xc] ss:$24 sps:$4 sm:$0xff]   ;;  %v3043_v54 = vld [vmem:[#allocation5 + $0x1b0] ss:$8 sps:$4 sm:$0xff]  }
  0x6d   : > { %1449 = vmatpush1.bf16.msra.mxu0 %v2992_v18  ;;  %v3041_v50 = vld [vmem:[#allocation5 + $0x1b4] ss:$8 sps:$4 sm:$0xff]   ;;  %v3044_v53 = vld [vmem:[#allocation5 + $0xa4] ss:$8 sps:$4 sm:$0xff]   ;;  %1665 = vmatprep.mubr.bf16.mxu1 %v3070_v51  ;;  %v3046_v56 = vld [vmem:[#allocation5 + $0xa0] ss:$8 sps:$4 sm:$0xff]  }
  0x6e   : > { %1450 = vmatprep.subr.bf16.mxu0 %v2996_v19  ;;  %1642 = vmatpush1.bf16.msra.mxu1 %v2995_v20  ;;  %v3047_v55 = vld [vmem:[#allocation5 + $0x1a4] ss:$8 sps:$4 sm:$0xff]   ;;  %v3050_v57 = vld [vmem:[#allocation5 + $0x94] ss:$8 sps:$4 sm:$0xff]   ;;  %v3049_v58 = vld [vmem:[#allocation5 + $0x1a0] ss:$8 sps:$4 sm:$0xff]  }
  0x6f   : > { %1643 = vmatprep.subr.bf16.mxu1 %v2999_v21  ;;  %v3053_v59 = vld [vmem:[#allocation5 + $0x194] ss:$8 sps:$4 sm:$0xff]   ;;  %v3052_v60 = vld [vmem:[#allocation5 + $0x90] ss:$8 sps:$4 sm:$0xff]   ;;  %v3056_v61 = vld [vmem:[#allocation5 + $0x84] ss:$8 sps:$4 sm:$0xff]  }
  0x70   : > { %v3055_v62 = vld [vmem:[#allocation5 + $0x190] ss:$8 sps:$4 sm:$0xff]   ;;  %v3059_v63 = vld [vmem:[#allocation5 + $0x184] ss:$8 sps:$4 sm:$0xff]   ;;  %v3058_v0 = vld [vmem:[#allocation5 + $0x80] ss:$8 sps:$4 sm:$0xff]  }
  0x71   : > { %1451 = vmatpush1.bf16.msra.mxu0 %v2998_v22  ;;  %v3067_v1 = vld [vmem:[#allocation5 + $0x274] ss:$8 sps:$4 sm:$0xff]   ;;  %v3064_v2 = vld [vmem:[#allocation5 + $0x180] ss:$8 sps:$4 sm:$0xff]   ;;  %v3065_v4 = vld [vmem:[#allocation5 + $0x270] ss:$8 sps:$4 sm:$0xff]  }
  0x72   : > { %1452 = vmatprep.subr.bf16.mxu0 %v3002_v23  ;;  %1644 = vmatpush1.bf16.msra.mxu1 %v3001_v24  ;;  %v3061_v3 = vld [vmem:[%s3593_s9] ss:$24 sps:$4 sm:$0xff]   ;;  %v3071_v6 = vld [vmem:[%s3593_s9 + $0x34] ss:$24 sps:$4 sm:$0xff]   ;;  %v3073_v11 = vld [vmem:[%s3593_s9 + $0x30] ss:$24 sps:$4 sm:$0xff]  }
  0x73   : > { %1645 = vmatprep.subr.bf16.mxu1 %v3005_v25  ;;  %v3068_v5 = vld [vmem:[%s3593_s9 + $0x8] ss:$24 sps:$4 sm:$0xff]   ;;  %v3076_v7 = vld [vmem:[#allocation5 + $0x264] ss:$8 sps:$4 sm:$0xff]   ;;  %v3077_v8 = vld [vmem:[%s3593_s9 + $0x3c] ss:$24 sps:$4 sm:$0xff]  }
  0x74   : > { %v3074_v9 = vld [vmem:[#allocation5 + $0x260] ss:$8 sps:$4 sm:$0xff]   ;;  %v3085_v10 = vld [vmem:[#allocation5 + $0x254] ss:$8 sps:$4 sm:$0xff]   ;;  %v3079_v12 = vld [vmem:[%s3593_s9 + $0x38] ss:$24 sps:$4 sm:$0xff]  }
  0x75   : > { %1453 = vmatpush1.bf16.msra.mxu0 %v3004_v26  ;;  %v3080_v13 = vld [vmem:[%s3593_s9 + $0x64] ss:$24 sps:$4 sm:$0xff]   ;;  %v3083_v14 = vld [vmem:[#allocation5 + $0x250] ss:$8 sps:$4 sm:$0xff]   ;;  %v3092_v17 = vld [vmem:[#allocation5 + $0x240] ss:$8 sps:$4 sm:$0xff]  }
  0x76   : > { %1454 = vmatprep.subr.bf16.mxu0 %v3008_v27  ;;  %1646 = vmatpush1.bf16.msra.mxu1 %v3007_v28  ;;  %v3094_v15 = vld [vmem:[#allocation5 + $0x244] ss:$8 sps:$4 sm:$0xff]   ;;  %v3103_v18 = vld [vmem:[#allocation5 + $0x234] ss:$8 sps:$4 sm:$0xff]   ;;  %v3082_v19 = vld [vmem:[%s3593_s9 + $0x60] ss:$24 sps:$4 sm:$0xff]  }
  0x77   : > { %1647 = vmatprep.subr.bf16.mxu1 %v3011_v29  ;;  %v3086_v16 = vld [vmem:[%s3593_s9 + $0x6c] ss:$24 sps:$4 sm:$0xff]   ;;  %v3088_v20 = vld [vmem:[%s3593_s9 + $0x68] ss:$24 sps:$4 sm:$0xff]   ;;  %v3101_v22 = vld [vmem:[#allocation5 + $0x230] ss:$8 sps:$4 sm:$0xff]  }
  0x78   : > { %v3089_v21 = vld [vmem:[%s3593_s9 + $0x94] ss:$24 sps:$4 sm:$0xff]   ;;  %v3110_v25 = vld [vmem:[#allocation5 + $0x220] ss:$8 sps:$4 sm:$0xff]   ;;  %v3097_v28 = vld [vmem:[%s3593_s9 + $0x98] ss:$24 sps:$4 sm:$0xff]  }
  0x79   : > { %1455 = vmatpush1.bf16.msra.mxu0 %v3010_v30  ;;  %v3112_v23 = vld [vmem:[#allocation5 + $0x224] ss:$8 sps:$4 sm:$0xff]   ;;  %v3095_v24 = vld [vmem:[%s3593_s9 + $0x9c] ss:$24 sps:$4 sm:$0xff]   ;;  %v3091_v27 = vld [vmem:[%s3593_s9 + $0x90] ss:$24 sps:$4 sm:$0xff]  }
  0x7a   : > { %1456 = vmatprep.subr.bf16.mxu0 %v3014_v31  ;;  %1648 = vmatpush1.bf16.msra.mxu1 %v3013_v32  ;;  %v3121_v26 = vld [vmem:[#allocation5 + $0x214] ss:$8 sps:$4 sm:$0xff]   ;;  %v3119_v30 = vld [vmem:[#allocation5 + $0x210] ss:$8 sps:$4 sm:$0xff]   ;;  %v3130_v31 = vld [vmem:[#allocation5 + $0x204] ss:$8 sps:$4 sm:$0xff]  }
  0x7b   : > { %1649 = vmatprep.subr.bf16.mxu1 %v3017_v33  ;;  %v3098_v29 = vld [vmem:[%s3593_s9 + $0xc4] ss:$24 sps:$4 sm:$0xff]   ;;  %v3128_v33 = vld [vmem:[#allocation5 + $0x200] ss:$8 sps:$4 sm:$0xff]   ;;  %s2560_s8 = sshll.u32 %s3589_s23, 8  ;;  %s2775_s29 = sshll.u32 %s3483_s22, 12 }
  0x7c   : > { %v3104_v32 = vld [vmem:[%s3593_s9 + $0xcc] ss:$24 sps:$4 sm:$0xff]   ;;  %v3118_v51 = vld [vmem:[%s3593_s9 + $0x120] ss:$24 sps:$4 sm:$0xff]   ;;  %s4134_s14 = scalar_lea.vmem [#allocation8], %s2560_s8  ;;  %s4202_s15 = scalar_lea.hbm %s4254_s5, %s2775_s29 }
  0x7d   : > { %1457 = vmatpush2.bf16.msra.mxu0 %v3016_v34  ;;  %v3139_v34 = vld [vmem:[#allocation5 + $0x2f4] ss:$8 sps:$4 sm:$0xff]   ;;  %v3166_v47 = vld [vmem:[#allocation5 + $0x2c4] ss:$8 sps:$4 sm:$0xff]   ;;  %s2457_s7 = sshll.u32 %s4134_s14, 4  ;;  %s2444_s16 = scalar_lea.sflag [#allocation4], %s3589_s23  ;;  %s4204_s7 = int_to_ptr.vmem [resolvable:$true] %s2457_s7 }
  0x7e   : > { %1458 = vmatprep.subr.bf16.mxu0 %v3020_v35  ;;  %1650 = vmatpush2.bf16.msra.mxu1 %v3019_v36  ;;  %v3100_v35 = vld [vmem:[%s3593_s9 + $0xc0] ss:$24 sps:$4 sm:$0xff]   ;;  %s3350_s27 = scalar_lea.vmem %s4204_s7, 4096  ;;  %p4366_p10 = scmp.ne.s32.totalorder %s4264_s30, 0 }
  0x7f   : > { %1651 = vmatprep.subr.bf16.mxu1 %v3023_v37  ;;  %v3106_v36 = vld [vmem:[%s3593_s9 + $0xc8] ss:$24 sps:$4 sm:$0xff]   ;;  %v3107_v37 = vld [vmem:[%s3593_s9 + $0xf4] ss:$24 sps:$4 sm:$0xff]   ;;  %p3351_p11 = scmp.ne.s32.totalorder %s4204_s7, %s3350_s27  ;;  %s3429_s22 = smov [#allocation8]  }
  0x80   : > { %s3354_s6 = sshll.u32 %s3429_s22, 4  ;;  %s3355_s6 = int_to_ptr.vmem [resolvable:$false] %s3354_s6 }
  0x81   : > { %1459 = vmatpush2.bf16.msra.mxu0 %v3022_v38  ;;  %v3137_v38 = vld [vmem:[#allocation5 + $0x2f0] ss:$8 sps:$4 sm:$0xff]   ;;  %p3352_p1 = pnand %p3351_p11, %p4366_p10  ;;  %p3357_p6 = scmp.lt.s32.totalorder %s4204_s7, %s3355_s6 }
  0x82   : > { %1460 = vmatprep.subr.bf16.mxu0 %v3026_v39  ;;  %1652 = vmatpush2.bf16.msra.mxu1 %v3025_v40  ;;  %v3148_v39 = vld [vmem:[#allocation5 + $0x2e4] ss:$8 sps:$4 sm:$0xff]   ;;  %v3113_v40 = vld [vmem:[%s3593_s9 + $0xfc] ss:$24 sps:$4 sm:$0xff]  }
  0x83   : > { %1653 = vmatprep.subr.bf16.mxu1 %v3029_v41  ;;  %v3146_v41 = vld [vmem:[#allocation5 + $0x2e0] ss:$8 sps:$4 sm:$0xff]   ;;  %p3353_p2 = pneg %p3352_p1 }
  0x85   : > { %1461 = vmatpush2.bf16.msra.mxu0 %v3028_v42  ;;  %v3157_v42 = vld [vmem:[#allocation5 + $0x2d4] ss:$8 sps:$4 sm:$0xff]  }
  0x86   : > { %1462 = vmatprep.subr.bf16.mxu0 %v3032_v43  ;;  %1654 = vmatpush2.bf16.msra.mxu1 %v3031_v44  ;;  %v3109_v43 = vld [vmem:[%s3593_s9 + $0xf0] ss:$24 sps:$4 sm:$0xff]  }
  0x87   : > { %1655 = vmatprep.subr.bf16.mxu1 %v3035_v45  ;;  %v3115_v44 = vld [vmem:[%s3593_s9 + $0xf8] ss:$24 sps:$4 sm:$0xff]   ;;  %v3116_v45 = vld [vmem:[%s3593_s9 + $0x124] ss:$24 sps:$4 sm:$0xff]  }
  0x89   : > { %1463 = vmatpush2.bf16.msra.mxu0 %v3034_v46  ;;  %v3155_v46 = vld [vmem:[#allocation5 + $0x2d0] ss:$8 sps:$4 sm:$0xff]  }
  0x8a   : > { %1464 = vmatprep.subr.bf16.mxu0 %v3038_v48  ;;  %1656 = vmatpush2.bf16.msra.mxu1 %v3037_v49  ;;  %v3122_v48 = vld [vmem:[%s3593_s9 + $0x12c] ss:$24 sps:$4 sm:$0xff]   ;;  %v3164_v49 = vld [vmem:[#allocation5 + $0x2c0] ss:$8 sps:$4 sm:$0xff]  }
  0x8b   : > { %1657 = vmatprep.subr.bf16.mxu1 %v3041_v50  ;;  %v3175_v50 = vld [vmem:[#allocation5 + $0x2b4] ss:$8 sps:$4 sm:$0xff]  }
  0x8d   : > { %1465 = vmatpush2.bf16.msra.mxu0 %v3040_v52  ;;  %v3124_v52 = vld [vmem:[%s3593_s9 + $0x128] ss:$24 sps:$4 sm:$0xff]  }
  0x8e   : > { %1466 = vmatprep.subr.bf16.mxu0 %v3044_v53  ;;  %1658 = vmatpush2.bf16.msra.mxu1 %v3043_v54  ;;  %v3125_v53 = vld [vmem:[%s3593_s9 + $0x154] ss:$24 sps:$4 sm:$0xff]   ;;  %v3173_v54 = vld [vmem:[#allocation5 + $0x2b0] ss:$8 sps:$4 sm:$0xff]  }
  0x8f   : > { %1659 = vmatprep.subr.bf16.mxu1 %v3047_v55  ;;  %v3184_v55 = vld [vmem:[#allocation5 + $0x2a4] ss:$8 sps:$4 sm:$0xff]  }
  0x91   : > { %1467 = vmatpush2.bf16.msra.mxu0 %v3046_v56  ;;  %v3131_v56 = vld [vmem:[%s3593_s9 + $0x15c] ss:$24 sps:$4 sm:$0xff]  }
  0x92   : > { %1468 = vmatprep.subr.bf16.mxu0 %v3050_v57  ;;  %1660 = vmatpush2.bf16.msra.mxu1 %v3049_v58  ;;  %v3182_v57 = vld [vmem:[#allocation5 + $0x2a0] ss:$8 sps:$4 sm:$0xff]  }
  0x93   : > { %1661 = vmatprep.subr.bf16.mxu1 %v3053_v59  ;;  %v3127_v58 = vld [vmem:[%s3593_s9 + $0x150] ss:$24 sps:$4 sm:$0xff]   ;;  %v3193_v59 = vld [vmem:[#allocation5 + $0x294] ss:$8 sps:$4 sm:$0xff]  }
  0x95   : > { %1469 = vmatpush2.bf16.msra.mxu0 %v3052_v60  ;;  %v3134_v60 = vld [vmem:[%s3593_s9 + $0x184] ss:$24 sps:$4 sm:$0xff]  }
  0x96   : > { %1470 = vmatprep.subr.bf16.mxu0 %v3056_v61  ;;  %1662 = vmatpush2.bf16.msra.mxu1 %v3055_v62  ;;  %v3191_v61 = vld [vmem:[#allocation5 + $0x290] ss:$8 sps:$4 sm:$0xff]  }
  0x97   : > { %1663 = vmatprep.subr.bf16.mxu1 %v3059_v63  ;;  %v3133_v62 = vld [vmem:[%s3593_s9 + $0x158] ss:$24 sps:$4 sm:$0xff]   ;;  %v3202_v63 = vld [vmem:[#allocation5 + $0x284] ss:$8 sps:$4 sm:$0xff]  }
  0x99   : > { %1471 = vmatpush2.bf16.msra.mxu0 %v3058_v0  ;;  %v3140_v0 = vld [vmem:[%s3593_s9 + $0x18c] ss:$24 sps:$4 sm:$0xff]  }
  0x9a   : > { %1826 = vmatprep.subr.bf16.mxu0 %v3067_v1  ;;  %1664 = vmatpush2.bf16.msra.mxu1 %v3064_v2  ;;  %v3200_v1 = vld [vmem:[#allocation5 + $0x280] ss:$8 sps:$4 sm:$0xff]  }
  0x9b   : > { %v3136_v2 = vld [vmem:[%s3593_s9 + $0x180] ss:$24 sps:$4 sm:$0xff]  }
  0x9c   : > { %1473 = vmatmul.mubr.bf16.vlgmr.msra.gmra.mxu0 %v3061_v3  ;;  %v3143_v3 = vld [vmem:[%s3593_s9 + $0x1b4] ss:$24 sps:$4 sm:$0xff]  }
  0x9d   : > { %1827 = vmatpush1.bf16.msra.mxu0 %v3065_v4  ;;  %1482 = vmatprep.mubr.bf16.mxu0 %v3071_v6  ;;  %v3142_v4 = vld [vmem:[%s3593_s9 + $0x188] ss:$24 sps:$4 sm:$0xff]  }
  0x9e   : > { %1666 = vmatmul.mubr.bf16.vlgmr.msra.gmra.mxu1 %v3068_v5  ;;  %1828 = vmatprep.subr.bf16.mxu0 %v3076_v7  ;;  %v3149_v5 = vld [vmem:[%s3593_s9 + $0x1bc] ss:$24 sps:$4 sm:$0xff]   ;;  %v3145_v6 = vld [vmem:[%s3593_s9 + $0x1b0] ss:$24 sps:$4 sm:$0xff]  }
  0x9f   : > { %1675 = vmatprep.mubr.bf16.mxu1 %v3077_v8  ;;  %v3152_v7 = vld [vmem:[%s3593_s9 + $0x1e4] ss:$24 sps:$4 sm:$0xff]   ;;  %v3151_v8 = vld [vmem:[%s3593_s9 + $0x1b8] ss:$24 sps:$4 sm:$0xff]  }
  0xa1   : > { %1829 = vmatpush1.bf16.msra.mxu0 %v3074_v9  ;;  %v3158_v9 = vld [vmem:[%s3593_s9 + $0x1ec] ss:$24 sps:$4 sm:$0xff]  }
  0xa2   : > { %1830 = vmatprep.subr.bf16.mxu0 %v3085_v10  ;;  %v3154_v10 = vld [vmem:[%s3593_s9 + $0x1e0] ss:$24 sps:$4 sm:$0xff]  }
  0xa4   : > { %1483 = vmatmul.mubr.bf16.gmra.mxu0 %v3073_v11  ;;  %v3161_v11 = vld [vmem:[%s3593_s9 + $0x214] ss:$24 sps:$4 sm:$0xff]  }
  0xa5   : > { %1492 = vmatprep.mubr.bf16.mxu0 %v3080_v13  ;;  %1831 = vmatpush1.bf16.msra.mxu0 %v3083_v14  ;;  %v3167_v13 = vld [vmem:[%s3593_s9 + $0x21c] ss:$24 sps:$4 sm:$0xff]  }
  0xa6   : > { %1676 = vmatmul.mubr.bf16.gmra.mxu1 %v3079_v12  ;;  %1832 = vmatprep.subr.bf16.mxu0 %v3094_v15  ;;  %v3160_v12 = vld [vmem:[%s3593_s9 + $0x1e8] ss:$24 sps:$4 sm:$0xff]   ;;  %v3236_v14 = vld [vmem:[#allocation7 + $0x78] sm:$0xff]  }
  0xa7   : > { %1685 = vmatprep.mubr.bf16.mxu1 %v3086_v16  ;;  %v3239_v15 = vld [vmem:[#allocation7 + $0x38] sm:$0xff]   ;;  %2776 = vmatprep.subr.bf16.mxu1 %v3236_v14  ;;  %v3163_v16 = vld [vmem:[%s3593_s9 + $0x210] ss:$24 sps:$4 sm:$0xff]  }
  0xa8   : > { %2777 = vmatpush3.bf16.msra.mxu1 %v3239_v15 }
  0xa9   : > { %1833 = vmatpush1.bf16.msra.mxu0 %v3092_v17  ;;  %v3170_v17 = vld [vmem:[%s3593_s9 + $0x244] ss:$24 sps:$4 sm:$0xff]  }
  0xaa   : > { %1834 = vmatprep.subr.bf16.mxu0 %v3103_v18  ;;  %v3169_v18 = vld [vmem:[%s3593_s9 + $0x218] ss:$24 sps:$4 sm:$0xff]  }
  0xac   : > { %1493 = vmatmul.mubr.bf16.gmra.mxu0 %v3082_v19  ;;  %v3176_v19 = vld [vmem:[%s3593_s9 + $0x24c] ss:$24 sps:$4 sm:$0xff]  }
  0xad   : > { %1502 = vmatprep.mubr.bf16.mxu0 %v3089_v21  ;;  %1835 = vmatpush1.bf16.msra.mxu0 %v3101_v22  ;;  %v3179_v21 = vld [vmem:[%s3593_s9 + $0x274] ss:$24 sps:$4 sm:$0xff]   ;;  %v3178_v22 = vld [vmem:[%s3593_s9 + $0x248] ss:$24 sps:$4 sm:$0xff]  }
  0xae   : > { %1686 = vmatmul.mubr.bf16.gmra.mxu1 %v3088_v20  ;;  %1836 = vmatprep.subr.bf16.mxu0 %v3112_v23  ;;  %v3172_v20 = vld [vmem:[%s3593_s9 + $0x240] ss:$24 sps:$4 sm:$0xff]   ;;  %v3185_v23 = vld [vmem:[%s3593_s9 + $0x27c] ss:$24 sps:$4 sm:$0xff]  }
  0xaf   : > { %1695 = vmatprep.mubr.bf16.mxu1 %v3095_v24  ;;  %v3244_v24 = vld [vmem:[#allocation7 + $0x70] sm:$0xff]  }
  0xb0   : > { %2778 = vmatprep.subr.bf16.mxu1 %v3244_v24  ;;  %v3243_v24 = vld [vmem:[%s3593_s9 + $0x220] ss:$24 sps:$4 sm:$0xff]  }
  0xb1   : > { %1837 = vmatpush1.bf16.msra.mxu0 %v3110_v25  ;;  %v3248_v25 = vld [vmem:[#allocation7 + $0x30] sm:$0xff]  }
  0xb2   : > { %1838 = vmatprep.subr.bf16.mxu0 %v3121_v26  ;;  %2779 = vmatpush3.bf16.msra.mxu1 %v3248_v25  ;;  %v3181_v26 = vld [vmem:[%s3593_s9 + $0x270] ss:$24 sps:$4 sm:$0xff]   ;;  %v3247_v25 = vld [vmem:[%s3593_s9 + $0x254] ss:$24 sps:$4 sm:$0xff]  }
  0xb4   : > { %1503 = vmatmul.mubr.bf16.gmra.mxu0 %v3091_v27  ;;  %v3188_v27 = vld [vmem:[%s3593_s9 + $0x2a4] ss:$24 sps:$4 sm:$0xff]  }
  0xb5   : > { %1512 = vmatprep.mubr.bf16.mxu0 %v3098_v29  ;;  %1839 = vmatpush1.bf16.msra.mxu0 %v3119_v30  ;;  %v3194_v29 = vld [vmem:[%s3593_s9 + $0x2ac] ss:$24 sps:$4 sm:$0xff]   ;;  %v3190_v30 = vld [vmem:[%s3593_s9 + $0x2a0] ss:$24 sps:$4 sm:$0xff]  }
  0xb6   : > { %1696 = vmatmul.mubr.bf16.gmra.mxu1 %v3097_v28  ;;  %1840 = vmatprep.subr.bf16.mxu0 %v3130_v31  ;;  %v3187_v28 = vld [vmem:[%s3593_s9 + $0x278] ss:$24 sps:$4 sm:$0xff]   ;;  %v3197_v31 = vld [vmem:[%s3593_s9 + $0x2d4] ss:$24 sps:$4 sm:$0xff]  }
  0xb7   : > { %1705 = vmatprep.mubr.bf16.mxu1 %v3104_v32  ;;  %v3196_v32 = vld [vmem:[%s3593_s9 + $0x2a8] ss:$24 sps:$4 sm:$0xff]  }
  0xb9   : > { %1841 = vmatpush1.bf16.msra.mxu0 %v3128_v33  ;;  %v3203_v33 = vld [vmem:[%s3593_s9 + $0x2dc] ss:$24 sps:$4 sm:$0xff]  }
  0xba   : > { %1842 = vmatprep.subr.bf16.mxu0 %v3139_v34  ;;  %v3252_v34 = vld [vmem:[#allocation7 + $0x68] sm:$0xff]  }
  0xbb   : > { %2780 = vmatprep.subr.bf16.mxu1 %v3252_v34 }
  0xbc   : > { %1513 = vmatmul.mubr.bf16.gmra.mxu0 %v3100_v35  ;;  %v3256_v35 = vld [vmem:[#allocation7 + $0x28] sm:$0xff]  }
  0xbd   : > { %1522 = vmatprep.mubr.bf16.mxu0 %v3107_v37  ;;  %1843 = vmatpush2.bf16.msra.mxu0 %v3137_v38  ;;  %v3208_v37 = vld [vmem:[%s3593_s9 + $0x14] ss:$24 sps:$4 sm:$0xff]   ;;  %v3205_v38 = vld [vmem:[%s3593_s9 + $0x2d8] ss:$24 sps:$4 sm:$0xff]  }
  0xbe   : > { %1706 = vmatmul.mubr.bf16.gmra.mxu1 %v3106_v36  ;;  %1844 = vmatprep.subr.bf16.mxu0 %v3148_v39  ;;  %v3199_v36 = vld [vmem:[%s3593_s9 + $0x2d0] ss:$24 sps:$4 sm:$0xff]  }
  0xbf   : > { %1715 = vmatprep.mubr.bf16.mxu1 %v3113_v40  ;;  %2781 = vmatpush3.bf16.msra.mxu1 %v3256_v35  ;;  %v3206_v39 = vld [vmem:[%s3593_s9 + $0x10] ss:$24 sps:$4 sm:$0xff]   ;;  %v3209_v40 = vld [vmem:[%s3593_s9 + $0x44] ss:$24 sps:$4 sm:$0xff]  }
  0xc1   : > { %1845 = vmatpush2.bf16.msra.mxu0 %v3146_v41  ;;  %v3260_v41 = vld [vmem:[#allocation7 + $0x60] sm:$0xff]  }
  0xc2   : > { %1846 = vmatprep.subr.bf16.mxu0 %v3157_v42  ;;  %v3261_v42 = vld [vmem:[#allocation7 + $0x20] sm:$0xff]   ;;  %2782 = vmatprep.subr.bf16.mxu1 %v3260_v41  ;;  %v3255_v41 = vld [vmem:[%s3593_s9 + $0x2b4] ss:$24 sps:$4 sm:$0xff]  }
  0xc3   : > { %2783 = vmatpush3.bf16.msra.mxu1 %v3261_v42 }
  0xc4   : > { %1523 = vmatmul.mubr.bf16.gmra.mxu0 %v3109_v43  ;;  %v3211_v43 = vld [vmem:[%s3593_s9 + $0x40] ss:$24 sps:$4 sm:$0xff]  }
  0xc5   : > { %1532 = vmatprep.mubr.bf16.mxu0 %v3116_v45  ;;  %1847 = vmatpush2.bf16.msra.mxu0 %v3155_v46  ;;  %v3214_v45 = vld [vmem:[%s3593_s9 + $0x70] ss:$24 sps:$4 sm:$0xff]   ;;  %v3215_v46 = vld [vmem:[%s3593_s9 + $0xa4] ss:$24 sps:$4 sm:$0xff]  }
  0xc6   : > { %1716 = vmatmul.mubr.bf16.gmra.mxu1 %v3115_v44  ;;  %1848 = vmatprep.subr.bf16.mxu0 %v3166_v47  ;;  %v3212_v44 = vld [vmem:[%s3593_s9 + $0x74] ss:$24 sps:$4 sm:$0xff]   ;;  %v3262_v47 = vld [vmem:[#allocation7 + $0x58] sm:$0xff]  }
  0xc7   : > { %1725 = vmatprep.mubr.bf16.mxu1 %v3122_v48  ;;  %v3263_v48 = vld [vmem:[#allocation7 + $0x18] sm:$0xff]   ;;  %2784 = vmatprep.subr.bf16.mxu1 %v3262_v47 }
  0xc8   : > { %2785 = vmatpush3.bf16.msra.mxu1 %v3263_v48  ;;  %v3253_v48 = vld [vmem:[%s3593_s9 + $0x2b0] ss:$24 sps:$4 sm:$0xff]  }
  0xc9   : > { %1849 = vmatpush2.bf16.msra.mxu0 %v3164_v49  ;;  %v3217_v49 = vld [vmem:[%s3593_s9 + $0xa0] ss:$24 sps:$4 sm:$0xff]  }
  0xca   : > { %1850 = vmatprep.subr.bf16.mxu0 %v3175_v50  ;;  %v3218_v50 = vld [vmem:[%s3593_s9 + $0xd4] ss:$24 sps:$4 sm:$0xff]  }
  0xcc   : > { %1533 = vmatmul.mubr.bf16.gmra.mxu0 %v3118_v51  ;;  %v3220_v51 = vld [vmem:[%s3593_s9 + $0xd0] ss:$24 sps:$4 sm:$0xff]  }
  0xcd   : > { %1542 = vmatprep.mubr.bf16.mxu0 %v3125_v53  ;;  %1851 = vmatpush2.bf16.msra.mxu0 %v3173_v54  ;;  %v3264_v53 = vld [vmem:[#allocation7 + $0x50] sm:$0xff]  }
  0xce   : > { %1726 = vmatmul.mubr.bf16.gmra.mxu1 %v3124_v52  ;;  %1852 = vmatprep.subr.bf16.mxu0 %v3184_v55  ;;  %v3221_v52 = vld [vmem:[%s3593_s9 + $0x104] ss:$24 sps:$4 sm:$0xff]   ;;  %v3265_v54 = vld [vmem:[#allocation7 + $0x10] sm:$0xff]   ;;  %v3223_v55 = vld [vmem:[%s3593_s9 + $0x100] ss:$24 sps:$4 sm:$0xff]  }
  0xcf   : > { %1735 = vmatprep.mubr.bf16.mxu1 %v3131_v56  ;;  %2786 = vmatprep.subr.bf16.mxu1 %v3264_v53  ;;  %v3224_v56 = vld [vmem:[%s3593_s9 + $0x134] ss:$24 sps:$4 sm:$0xff]  }
  0xd0   : > { %2787 = vmatpush3.bf16.msra.mxu1 %v3265_v54 }
  0xd1   : > { %1853 = vmatpush2.bf16.msra.mxu0 %v3182_v57  ;;  %v3226_v57 = vld [vmem:[%s3593_s9 + $0x130] ss:$24 sps:$4 sm:$0xff]  }
  0xd2   : > { %1854 = vmatprep.subr.bf16.mxu0 %v3193_v59  ;;  %v3266_v59 = vld [vmem:[#allocation7 + $0x48] sm:$0xff]  }
  0xd3   : > { %2788 = vmatprep.subr.bf16.mxu1 %v3266_v59 }
  0xd4   : > { %1543 = vmatmul.mubr.bf16.gmra.mxu0 %v3127_v58  ;;  %v3227_v58 = vld [vmem:[%s3593_s9 + $0x164] ss:$24 sps:$4 sm:$0xff]  }
  0xd5   : > { %1552 = vmatprep.mubr.bf16.mxu0 %v3134_v60  ;;  %1855 = vmatpush2.bf16.msra.mxu0 %v3191_v61  ;;  %v3267_v60 = vld [vmem:[#allocation7 + $0x8] sm:$0xff]   ;;  %v3229_v61 = vld [vmem:[%s3593_s9 + $0x160] ss:$24 sps:$4 sm:$0xff]  }
  0xd6   : > { %1736 = vmatmul.mubr.bf16.gmra.mxu1 %v3133_v62  ;;  %1856 = vmatprep.subr.bf16.mxu0 %v3202_v63  ;;  %v3230_v62 = vld [vmem:[%s3593_s9 + $0x194] ss:$24 sps:$4 sm:$0xff]   ;;  %v3232_v63 = vld [vmem:[%s3593_s9 + $0x190] ss:$24 sps:$4 sm:$0xff]  }
  0xd7   : > { %1745 = vmatprep.mubr.bf16.mxu1 %v3140_v0  ;;  %2789 = vmatpush3.bf16.msra.mxu1 %v3267_v60  ;;  %v3233_v0 = vld [vmem:[%s3593_s9 + $0x1c4] ss:$24 sps:$4 sm:$0xff]  }
  0xd9   : > { %1857 = vmatpush2.bf16.msra.mxu0 %v3200_v1  ;;  %v3268_v1 = vld [vmem:[#allocation7 + $0x40] sm:$0xff]  }
  0xda   : > { %2790 = vmatprep.subr.bf16.mxu1 %v3268_v1 }
  0xdc   : > { %1553 = vmatmul.mubr.bf16.gmra.mxu0 %v3136_v2  ;;  %v3269_v2 = vld [vmem:[#allocation7] sm:$0xff]  }
  0xdd   : > { %1562 = vmatprep.mubr.bf16.mxu0 %v3143_v3  ;;  %2791 = vmatpush3.bf16.msra.mxu1 %v3269_v2 }
  0xde   : > { %1746 = vmatmul.mubr.bf16.gmra.mxu1 %v3142_v4 }
  0xdf   : > { %1755 = vmatprep.mubr.bf16.mxu1 %v3149_v5 }
  0xe4   : > { %1563 = vmatmul.mubr.bf16.gmra.mxu0 %v3145_v6 }
  0xe5   : > { %1572 = vmatprep.mubr.bf16.mxu0 %v3152_v7 }
  0xe6   : > { %1756 = vmatmul.mubr.bf16.gmra.mxu1 %v3151_v8  ;;  %v3235_v8 = vld [vmem:[%s3593_s9 + $0x1c0] ss:$24 sps:$4 sm:$0xff]  }
  0xe7   : > { %1765 = vmatprep.mubr.bf16.mxu1 %v3158_v9  ;;  %v3237_v9 = vld [vmem:[%s3593_s9 + $0x1f4] ss:$24 sps:$4 sm:$0xff]  }
  0xec   : > { %1573 = vmatmul.mubr.bf16.gmra.mxu0 %v3154_v10 }
  0xed   : > { %1582 = vmatprep.mubr.bf16.mxu0 %v3161_v11 }
  0xee   : > { %1766 = vmatmul.mubr.bf16.gmra.mxu1 %v3160_v12 }
  0xef   : > { %1775 = vmatprep.mubr.bf16.mxu1 %v3167_v13 }
  0xf4   : > { %1583 = vmatmul.mubr.bf16.gmra.mxu0 %v3163_v16  ;;  %v3240_v16 = vld [vmem:[%s3593_s9 + $0x1f0] ss:$24 sps:$4 sm:$0xff]  }
  0xf5   : > { %1592 = vmatprep.mubr.bf16.mxu0 %v3170_v17  ;;  %v3241_v17 = vld [vmem:[%s3593_s9 + $0x224] ss:$24 sps:$4 sm:$0xff]  }
  0xf6   : > { %1776 = vmatmul.mubr.bf16.gmra.mxu1 %v3169_v18 }
  0xf7   : > { %1785 = vmatprep.mubr.bf16.mxu1 %v3176_v19 }
  0xfc   : > { %1593 = vmatmul.mubr.bf16.gmra.mxu0 %v3172_v20 }
  0xfd   : > { %1602 = vmatprep.mubr.bf16.mxu0 %v3179_v21 }
  0xfe   : > { %1786 = vmatmul.mubr.bf16.gmra.mxu1 %v3178_v22 }
  0xff   : > { %1795 = vmatprep.mubr.bf16.mxu1 %v3185_v23 }
 0x104   : > { %1603 = vmatmul.mubr.bf16.gmra.mxu0 %v3181_v26 }
 0x105   : > { %1612 = vmatprep.mubr.bf16.mxu0 %v3188_v27 }
 0x106   : > { %1796 = vmatmul.mubr.bf16.gmra.mxu1 %v3187_v28 }
 0x107   : > { %1805 = vmatprep.mubr.bf16.mxu1 %v3194_v29 }
 0x10c   : > { %1613 = vmatmul.mubr.bf16.gmra.mxu0 %v3190_v30 }
 0x10d   : > { %1622 = vmatprep.mubr.bf16.mxu0 %v3197_v31 }
 0x10e   : > { %1806 = vmatmul.mubr.bf16.gmra.mxu1 %v3196_v32  ;;  %v3245_v32 = vld [vmem:[%s3593_s9 + $0x250] ss:$24 sps:$4 sm:$0xff]  }
 0x10f   : > { %1815 = vmatprep.mubr.bf16.mxu1 %v3203_v33  ;;  %v3251_v33 = vld [vmem:[%s3593_s9 + $0x284] ss:$24 sps:$4 sm:$0xff]  }
 0x114   : > { %1623 = vmatmul.mubr.bf16.gmra.mxu0 %v3199_v36 }
 0x115   : > { %1858 = vmatprep.mubr.bf16.mxu0 %v3208_v37 }
 0x116   : > { %1816 = vmatmul.mubr.bf16.gmra.mxu1 %v3205_v38 }
 0x11c   : > { %1859 = vmatmul.mubr.bf16.vlgmr.msra.gmra.mxu0 %v3206_v39 }
 0x11d   : > { %1868 = vmatprep.mubr.bf16.mxu0 %v3209_v40  ;;  %v3249_v40 = vld [vmem:[%s3593_s9 + $0x280] ss:$24 sps:$4 sm:$0xff]  }
 0x124   : > { %1869 = vmatmul.mubr.bf16.gmra.mxu0 %v3211_v43 }
 0x125   : > { %1878 = vmatprep.mubr.bf16.mxu0 %v3212_v44 }
 0x12c   : > { %1879 = vmatmul.mubr.bf16.gmra.mxu0 %v3214_v45 }
 0x12d   : > { %1888 = vmatprep.mubr.bf16.mxu0 %v3215_v46 }
 0x134   : > { %1889 = vmatmul.mubr.bf16.gmra.mxu0 %v3217_v49  ;;  %v3259_v49 = vld [vmem:[%s3593_s9 + $0x2e4] ss:$24 sps:$4 sm:$0xff]  }
 0x135   : > { %1898 = vmatprep.mubr.bf16.mxu0 %v3218_v50 }
 0x13c   : > { %1899 = vmatmul.mubr.bf16.gmra.mxu0 %v3220_v51 }
 0x13d   : > { %1908 = vmatprep.mubr.bf16.mxu0 %v3221_v52 }
 0x144   : > { %1909 = vmatmul.mubr.bf16.gmra.mxu0 %v3223_v55 }
 0x145   : > { %1918 = vmatprep.mubr.bf16.mxu0 %v3224_v56  ;;  %v3257_v56 = vld [vmem:[%s3593_s9 + $0x2e0] ss:$24 sps:$4 sm:$0xff]   ;;  %s3356_s9 = scalar_lea.vmem %s3355_s6, 8192 }
 0x146   : > { %p3358_p12 = scmp.lt.s32.totalorder %s3356_s9, %s3350_s27 }
 0x148   : > { %p3359_p3 = por %p3358_p12, %p3357_p6 }
 0x14a   : > { %p3360_p9 = pnand %p3359_p3, %p3353_p2 }
 0x14c   : > { %1919 = vmatmul.mubr.bf16.gmra.mxu0 %v3226_v57 }
 0x14d   : > { %1928 = vmatprep.mubr.bf16.mxu0 %v3227_v58 }
 0x154   : > { %1929 = vmatmul.mubr.bf16.gmra.mxu0 %v3229_v61 }
 0x155   : > { %1938 = vmatprep.mubr.bf16.mxu0 %v3230_v62 }
 0x15c   : > { %v3686_v3 = vpop.f32.mrf.mxu0  ;;  %1939 = vmatmul.mubr.bf16.gmra.mxu0 %v3232_v63 }
 0x15d   : > { %1948 = vmatprep.mubr.bf16.mxu0 %v3233_v0 }
 0x15e   : > { %v3688_v4 = vpop.f32.mrf.mxu0  ;;  %v3690_v5 = vpop.f32.mrf.mxu1 }
 0x160   : > { %v3692_v6 = vpop.f32.mrf.mxu0  ;;  %v3694_v7 = vpop.f32.mrf.mxu1 }
 0x162   : > { %v3698_v10 = vpop.f32.mrf.mxu0  ;;  %v3700_v11 = vpop.f32.mrf.mxu1 }
 0x164   : > { %v3702_v12 = vpop.f32.mrf.mxu0  ;;  %1949 = vmatmul.mubr.bf16.gmra.mxu0 %v3235_v8  ;;  %v3704_v13 = vpop.f32.mrf.mxu1 }
 0x165   : > { %1958 = vmatprep.mubr.bf16.mxu0 %v3237_v9 }
 0x166   : > { %v3706_v14 = vpop.f32.mrf.mxu0  ;;  %v3712_v18 = vpop.f32.mrf.mxu1 }
 0x168   : > { %v3708_v15 = vpop.f32.mrf.mxu0  ;;  %v3718_v21 = vpop.f32.mrf.mxu1 }
 0x16a   : > { %v3714_v19 = vpop.f32.mrf.mxu0  ;;  %v3726_v26 = vpop.f32.mrf.mxu1 }
 0x16c   : > { %v3716_v20 = vpop.f32.mrf.mxu0  ;;  %1959 = vmatmul.mubr.bf16.gmra.mxu0 %v3240_v16  ;;  %v3732_v29 = vpop.f32.mrf.mxu1 }
 0x16d   : > { %1968 = vmatprep.mubr.bf16.mxu0 %v3241_v17 }
 0x16e   : > { %v3720_v22 = vpop.f32.mrf.mxu0  ;;  %v3740_v34 = vpop.f32.mrf.mxu1 }
 0x170   : > { %v3722_v23 = vpop.f32.mrf.mxu0  ;;  %v3746_v37 = vpop.f32.mrf.mxu1 }
 0x172   : > { %v3728_v27 = vpop.f32.mrf.mxu0  ;;  %v3754_v42 = vpop.f32.mrf.mxu1 }
 0x174   : > { %v3730_v28 = vpop.f32.mrf.mxu0  ;;  %1969 = vmatmul.mubr.bf16.gmra.mxu0 %v3243_v24  ;;  %v3760_v45 = vpop.f32.mrf.mxu1 }
 0x175   : > { %1978 = vmatprep.mubr.bf16.mxu0 %v3247_v25 }
 0x176   : > { %v3734_v30 = vpop.f32.mrf.mxu0  ;;  %v3768_v50 = vpop.f32.mrf.mxu1 }
 0x178   : > { %v3736_v31 = vpop.f32.mrf.mxu0  ;;  %v3774_v53 = vpop.f32.mrf.mxu1 }
 0x17a   : > { %v3742_v35 = vpop.f32.mrf.mxu0  ;;  %v3781_v57 = vpop.f32.mrf.mxu1 }
 0x17c   : > { %v3744_v36 = vpop.f32.mrf.mxu0  ;;  %1979 = vmatmul.mubr.bf16.gmra.mxu0 %v3245_v32  ;;  %v3787_v60 = vpop.f32.mrf.mxu1 }
 0x17d   : > { %1988 = vmatprep.mubr.bf16.mxu0 %v3251_v33 }
 0x17e   : > { %v3748_v38 = vpop.f32.mrf.mxu0  ;;  %v3793_v63 = vpop.f32.mrf.mxu1 }
 0x180   : > { %v3750_v39 = vpop.f32.mrf.mxu0  ;;  %v3799_v2 = vpop.f32.mrf.mxu1 }
 0x182   : > { %v3756_v43 = vpop.f32.mrf.mxu0  ;;  %v3805_v16 = vpop.f32.mrf.mxu1 }
 0x184   : > { %v3758_v44 = vpop.f32.mrf.mxu0  ;;  %1989 = vmatmul.mubr.bf16.gmra.mxu0 %v3249_v40  ;;  %v3811_v25 = vpop.f32.mrf.mxu1 }
 0x185   : > { %1998 = vmatprep.mubr.bf16.mxu0 %v3255_v41 }
 0x186   : > { %v3762_v46 = vpop.f32.mrf.mxu0  ;;  %v3817_v40 = vpop.f32.mrf.mxu1 }
 0x188   : > { %v3764_v47 = vpop.f32.mrf.mxu0 }
 0x18a   : > { %v3770_v51 = vpop.f32.mrf.mxu0 }
 0x18c   : > { %v3772_v52 = vpop.f32.mrf.mxu0  ;;  %1999 = vmatmul.mubr.bf16.gmra.mxu0 %v3253_v48 }
 0x18d   : > { %2008 = vmatprep.mubr.bf16.mxu0 %v3259_v49  ;;  %v3823_v49 = vpop.f32.mrf.mxu1 }
 0x18e   : > { %v3776_v54 = vpop.f32.mrf.mxu0 }
 0x18f   : > { %4270 = vst [vmem:[#allocation12_spill] sm:$0xff] %v3776_v54 }
 0x190   : > { %v3778_v55 = vpop.f32.mrf.mxu0 }
 0x191   : > { %4271 = vst [vmem:[#allocation13_spill] sm:$0xff] %v3778_v55 }
 0x192   : > { %v3783_v58 = vpop.f32.mrf.mxu0 }
 0x193   : > { %4272 = vst [vmem:[#allocation14_spill] sm:$0xff] %v3783_v58 }
 0x194   : > { %v3785_v59 = vpop.f32.mrf.mxu0  ;;  %2009 = vmatmul.mubr.bf16.gmra.mxu0 %v3257_v56 }
 0x195   : > { %4273 = vst [vmem:[#allocation15_spill] sm:$0xff] %v3785_v59 }
 0x196   : > { %v3789_v61 = vpop.f32.mrf.mxu0 }
 0x197   : > { %4274 = vst [vmem:[#allocation16_spill] sm:$0xff] %v3789_v61 }
 0x198   : > { %v3791_v62 = vpop.f32.mrf.mxu0 }
 0x199   : > { %4275 = vst [vmem:[#allocation17_spill] sm:$0xff] %v3791_v62 }
 0x19a   : > { %v3795_v0 = vpop.f32.mrf.mxu0 }
 0x19b   : > { %4276 = vst [vmem:[#allocation18_spill] sm:$0xff] %v3795_v0 }
 0x19c   : > { %v3797_v1 = vpop.f32.mrf.mxu0 }
 0x19d   : > { %4277 = vst [vmem:[#allocation19_spill] sm:$0xff] %v3797_v1 }
 0x19e   : > { %v3801_v8 = vpop.f32.mrf.mxu0 }
 0x19f   : > { %4278 = vst [vmem:[#allocation20_spill] sm:$0xff] %v3801_v8 }
 0x1a0   : > { %v3803_v9 = vpop.f32.mrf.mxu0 }
 0x1a1   : > { %4279 = vst [vmem:[#allocation21_spill] sm:$0xff] %v3803_v9 }
 0x1a2   : > { %v3807_v17 = vpop.f32.mrf.mxu0 }
 0x1a3   : > { %4280 = vst [vmem:[#allocation22_spill] sm:$0xff] %v3807_v17  ;;  %v3829_v17 = vpop.f32.mrf.mxu1 }
 0x1a4   : > { %v3809_v24 = vpop.f32.mrf.mxu0 }
 0x1a5   : > { %4281 = vst [vmem:[#allocation23_spill] sm:$0xff] %v3809_v24 }
 0x1a6   : > { %v3813_v32 = vpop.f32.mrf.mxu0 }
 0x1a7   : > { %4282 = vst [vmem:[#allocation24_spill] sm:$0xff] %v3813_v32  ;;  %v3835_v32 = vpop.f32.mrf.mxu1 }
 0x1a8   : > { %v3815_v33 = vpop.f32.mrf.mxu0 }
 0x1a9   : > { %4283 = vst [vmem:[#allocation25_spill] sm:$0xff] %v3815_v33 }
 0x1aa   : > { %v3819_v41 = vpop.f32.mrf.mxu0 }
 0x1ab   : > { %4284 = vst [vmem:[#allocation26_spill] sm:$0xff] %v3819_v41  ;;  %v3841_v41 = vpop.f32.mrf.mxu1 }
 0x1ac   : > { %v3821_v48 = vpop.f32.mrf.mxu0  ;;  %4292 = vst [vmem:[#allocation34_spill] sm:$0xff] %v3841_v41 }
 0x1ad   : > { %4285 = vst [vmem:[#allocation27_spill] sm:$0xff] %v3821_v48 }
 0x1ae   : > { %v3825_v56 = vpop.f32.mrf.mxu0 }
 0x1af   : > { %4286 = vst [vmem:[#allocation28_spill] sm:$0xff] %v3825_v56  ;;  %v3847_v56 = vpop.f32.mrf.mxu1 }
 0x1b0   : > { %v3827_v9 = vpop.f32.mrf.mxu0  ;;  %4295 = vst [vmem:[#allocation37_spill] sm:$0xff] %v3847_v56 }
 0x1b1   : > { %4287 = vst [vmem:[#allocation29_spill] sm:$0xff] %v3827_v9 }
 0x1b2   : > { %v3831_v24 = vpop.f32.mrf.mxu0 }
 0x1b3   : > { %4288 = vst [vmem:[#allocation30_spill] sm:$0xff] %v3831_v24  ;;  %v3853_v24 = vpop.f32.mrf.mxu1 }
 0x1b4   : > { %v3833_v8 = vpop.f32.mrf.mxu0  ;;  %4298 = vst [vmem:[#allocation40_spill] sm:$0xff] %v3853_v24 }
 0x1b5   : > { %4289 = vst [vmem:[#allocation31_spill] sm:$0xff] %v3833_v8 }
 0x1b6   : > { %v3837_v33 = vpop.f32.mrf.mxu0 }
 0x1b7   : > { %4290 = vst [vmem:[#allocation32_spill] sm:$0xff] %v3837_v33  ;;  %v3859_v33 = vpop.f32.mrf.mxu1 }
 0x1b8   : > { %v3839_v1 = vpop.f32.mrf.mxu0  ;;  %4301 = vst [vmem:[#allocation43_spill] sm:$0xff] %v3859_v33 }
 0x1b9   : > { %4291 = vst [vmem:[#allocation33_spill] sm:$0xff] %v3839_v1 }
 0x1ba   : > { %v3843_v48 = vpop.f32.mrf.mxu0 }
 0x1bb   : > { %4293 = vst [vmem:[#allocation35_spill] sm:$0xff] %v3843_v48  ;;  %v470_v48 = vlaneseq }
 0x1bc   : > { %v3845_v0 = vpop.f32.mrf.mxu0 }
 0x1bd   : > { %4294 = vst [vmem:[#allocation36_spill] sm:$0xff] %v3845_v0  ;;  %v3865_v0 = vpop.f32.mrf.mxu1 }
 0x1be   : > { %v3849_v9 = vpop.f32.mrf.mxu0  ;;  %4304 = vst [vmem:[#allocation46_spill] sm:$0xff] %v3865_v0 }
 0x1bf   : > { %4296 = vst [vmem:[#allocation38_spill] sm:$0xff] %v3849_v9  ;;  %v3871_v58 = vpop.f32.mrf.mxu1 }
 0x1c0   : > { %v3851_v62 = vpop.f32.mrf.mxu0  ;;  %4307 = vst [vmem:[#allocation49_spill] sm:$0xff] %v3871_v58 }
 0x1c1   : > { %4297 = vst [vmem:[#allocation39_spill] sm:$0xff] %v3851_v62  ;;  %v471_v62 = vshrl.u32 %v470_v48, 7 }
 0x1c2   : > { %v3855_v8 = vpop.f32.mrf.mxu0 }
 0x1c3   : > { %4299 = vst [vmem:[#allocation41_spill] sm:$0xff] %v3855_v8  ;;  %v476_v0 = vsub.s32 1, %v471_v62 }
 0x1c4   : > { %v3857_v61 = vpop.f32.mrf.mxu0 }
 0x1c5   : > { %4300 = vst [vmem:[#allocation42_spill] sm:$0xff] %v3857_v61  ;;  %v472_v61 = vsub.s32 0, %v471_v62 }
 0x1c6   : > { %v3861_v1 = vpop.f32.mrf.mxu0 }
 0x1c7   : > { %4302 = vst [vmem:[#allocation44_spill] sm:$0xff] %v3861_v1  ;;  %v468_v1 = vld [vmem:[%s4251_s2] sm:$0x3] }
 0x1c8   : > { %v3863_v59 = vpop.f32.mrf.mxu0 }
 0x1c9   : > { %4303 = vst [vmem:[#allocation45_spill] sm:$0xff] %v3863_v59  ;;  %v3880_v59 = vpop.f32.mrf.mxu1 }
 0x1ca   : > { %v3867_v56 = vpop.f32.mrf.mxu0  ;;  %4310 = vst [vmem:[#allocation52_spill] sm:$0xff] %v3880_v59 }
 0x1cb   : > { %4305 = vst [vmem:[#allocation47_spill] sm:$0xff] %v3867_v56  ;;  %v3888_v48 = vpop.f32.mrf.mxu1 }
 0x1cc   : > { %v3869_v9 = vpop.f32.mrf.mxu0  ;;  %4313 = vst [vmem:[#allocation55_spill] sm:$0xff] %v3888_v48 }
 0x1cd   : > { %4306 = vst [vmem:[#allocation48_spill] sm:$0xff] %v3869_v9  ;;  %v3886_v9 = vrot.slane %v468_v1, %v472_v61  ;;  %v3898_v55 = vpop.f32.mrf.mxu1 }
 0x1ce   : > { %v3873_v24 = vpop.f32.mrf.mxu0  ;;  %4316 = vst [vmem:[#allocation58_spill] sm:$0xff] %v3898_v55 }
 0x1cf   : > { %4308 = vst [vmem:[#allocation50_spill] sm:$0xff] %v3873_v24  ;;  %v3892_v24 = vrot.slane %v468_v1, %v476_v0  ;;  %v1475_v41 = vadd.f32 %v3686_v3, %v3886_v9  ;;  %v1479_v61 = vadd.f32 %v3692_v6, %v3886_v9  ;;  %v3909_v1 = vpop.f32.mrf.mxu1 }
 0x1d0   : > { %v3875_v8 = vpop.f32.mrf.mxu0 }
 0x1d1   : > { %4309 = vst [vmem:[#allocation51_spill] sm:$0xff] %v3875_v8  ;;  %v1477_v62 = vadd.f32 %v3688_v4, %v3892_v24  ;;  %v1481_v0 = vadd.f32 %v3698_v10, %v3892_v24  ;;  %v1485_v4 = vadd.f32 %v3702_v12, %v3886_v9  ;;  %v3918_v10 = vpop.f32.mrf.mxu1 }
 0x1d2   : > { %v3882_v33 = vpop.f32.mrf.mxu0 }
 0x1d3   : > { %4311 = vst [vmem:[#allocation53_spill] sm:$0xff] %v3882_v33  ;;  %v1670_v3 = vadd.f32 %v3694_v7, %v1477_v62  ;;  %v1672_v33 = vadd.f32 %v3700_v11, %v1479_v61  ;;  %v1674_v6 = vadd.f32 %v3704_v13, %v1481_v0  ;;  %v1489_v7 = vadd.f32 %v3708_v15, %v3886_v9  ;;  %v3925_v61 = vpop.f32.mrf.mxu1 }
 0x1d4   : > { %v3884_v56 = vpop.f32.mrf.mxu0  ;;  %v1491_v13 = vadd.f32 %v3714_v19, %v3892_v24 }
 0x1d5   : > { %4312 = vst [vmem:[#allocation54_spill] sm:$0xff] %v3884_v56 }
 0x1d6   : > { %v3890_v58 = vpop.f32.mrf.mxu0 }
 0x1d7   : > { %4314 = vst [vmem:[#allocation56_spill] sm:$0xff] %v3890_v58  ;;  %v1668_v58 = vadd.f32 %v3690_v5, %v1475_v41  ;;  %v1487_v5 = vadd.f32 %v3706_v14, %v3892_v24 }
 0x1d8   : > { %v3894_v8 = vpop.f32.mrf.mxu0 }
 0x1d9   : > { %4315 = vst [vmem:[#allocation57_spill] sm:$0xff] %v3894_v8  ;;  %v1680_v0 = vadd.f32 %v3718_v21, %v1487_v5  ;;  %v1499_v21 = vadd.f32 %v3722_v23, %v3886_v9 }
 0x1da   : > { %v3900_v59 = vpop.f32.mrf.mxu0 }
 0x1db   : > { %4317 = vst [vmem:[#allocation59_spill] sm:$0xff] %v3900_v59 }
 0x1dc   : > { %v1860_v56 = vpop.f32.mrf.mxu0 }
 0x1dd   : > { %v1861_v59 = vadd.f32 %v1860_v56, %v1668_v58  ;;  %v1678_v56 = vadd.f32 %v3712_v18, %v1485_v4  ;;  %v1684_v4 = vadd.f32 %v3732_v29, %v1491_v13  ;;  %v1501_v29 = vadd.f32 %v3728_v27, %v3892_v24 }
 0x1de   : > { %v1862_v8 = vpop.f32.mrf.mxu0 }
 0x1df   : > { %v1863_v48 = vadd.f32 %v1862_v8, %v1670_v3  ;;  %v2019_v62 = vmax.f32 %v1861_v59, 0.0  ;;  %v1682_v3 = vadd.f32 %v3726_v26, %v1489_v7 }
 0x1e0   : > { %v1864_v55 = vpop.f32.mrf.mxu0 }
 0x1e1   : > { %v1865_v54 = vadd.f32 %v1864_v55, %v1672_v33  ;;  %v2020_v8 = vmax.f32 %v1863_v48, 0.0  ;;  %v1497_v48 = vadd.f32 %v3720_v22, %v3892_v24 }
 0x1e2   : > { %v1866_v41 = vpop.f32.mrf.mxu0 }
 0x1e3   : > { %v2021_v11 = vmax.f32 %v1865_v54, 0.0  ;;  %v1867_v58 = vadd.f32 %v1866_v41, %v1674_v6  ;;  %v1495_v54 = vadd.f32 %v3716_v20, %v3886_v9  ;;  %v3934_v41 = vpop.f32.mrf.mxu1 }
 0x1e4   : > { %v1870_v12 = vpop.f32.mrf.mxu0 }
 0x1e5   : > { %v2083_v55 = vpack.c.bf16 %v2021_v11, %v2019_v62  ;;  %v2022_v33 = vmax.f32 %v1867_v58, 0.0  ;;  %v1871_v59 = vadd.f32 %v1870_v12, %v1678_v56  ;;  %v1688_v20 = vadd.f32 %v3740_v34, %v1495_v54  ;;  %v3941_v22 = vpop.f32.mrf.mxu1 }
 0x1e6   : > { %v1872_v14 = vpop.f32.mrf.mxu0 }
 0x1e7   : > { %v2084_v15 = vpack.c.bf16 %v2022_v33, %v2020_v8  ;;  %v1873_v6 = vadd.f32 %v1872_v14, %v1680_v0  ;;  %v2023_v26 = vmax.f32 %v1871_v59, 0.0  ;;  %v1690_v8 = vadd.f32 %v3746_v37, %v1497_v48  ;;  %v3950_v59 = vpop.f32.mrf.mxu1 }
 0x1e8   : > { %v1874_v18 = vpop.f32.mrf.mxu0  ;;  %v1505_v14 = vadd.f32 %v3730_v28, %v3886_v9  ;;  %v1694_v0 = vadd.f32 %v3760_v45, %v1501_v29  ;;  %v1509_v37 = vadd.f32 %v3736_v31, %v3886_v9  ;;  %v1511_v45 = vadd.f32 %v3742_v35, %v3892_v24 }
 0x1e9   : > { %v1875_v19 = vadd.f32 %v1874_v18, %v1682_v3  ;;  %2282 = vmatprep.mubr.bf16.mxu1 %v2084_v15  ;;  %v2024_v58 = vmax.f32 %v1873_v6, 0.0  ;;  %v1507_v15 = vadd.f32 %v3734_v30, %v3892_v24  ;;  %v3957_v30 = vpop.f32.mrf.mxu1 }
 0x1ea   : > { %v1876_v62 = vpop.f32.mrf.mxu0  ;;  %2283 = vmatmul.mubr.bf16.vlgmr.msra.gmra.mxu1 %v2083_v55  ;;  %v1692_v55 = vadd.f32 %v3754_v42, %v1499_v21  ;;  %v1698_v28 = vadd.f32 %v3768_v50, %v1505_v14 }
 0x1eb   : > { %v2025_v5 = vmax.f32 %v1875_v19, 0.0  ;;  %v1877_v7 = vadd.f32 %v1876_v62, %v1684_v4 }
 0x1ec   : > { %v1880_v11 = vpop.f32.mrf.mxu0 }
 0x1ed   : > { %v2085_v56 = vpack.c.bf16 %v2025_v5, %v2023_v26  ;;  %v2026_v12 = vmax.f32 %v1877_v7, 0.0  ;;  %v1881_v33 = vadd.f32 %v1880_v11, %v1688_v20  ;;  %v1700_v26 = vadd.f32 %v3774_v53, %v1507_v15 }
 0x1ee   : > { %v1882_v13 = vpop.f32.mrf.mxu0  ;;  %v1702_v5 = vadd.f32 %v3781_v57, %v1509_v37  ;;  %v1515_v20 = vadd.f32 %v3744_v36, %v3886_v9  ;;  %v1704_v11 = vadd.f32 %v3787_v60, %v1511_v45  ;;  %v1519_v53 = vadd.f32 %v3750_v39, %v3886_v9 }
 0x1ef   : > { %v2086_v23 = vpack.c.bf16 %v2026_v12, %v2024_v58  ;;  %v1883_v3 = vadd.f32 %v1882_v13, %v1690_v8  ;;  %v2027_v42 = vmax.f32 %v1881_v33, 0.0  ;;  %v1517_v58 = vadd.f32 %v3748_v38, %v3892_v24 }
 0x1f0   : > { %v1884_v34 = vpop.f32.mrf.mxu0  ;;  %v1708_v36 = vadd.f32 %v3793_v63, %v1515_v20  ;;  %v1521_v60 = vadd.f32 %v3756_v43, %v3892_v24  ;;  %v1525_v15 = vadd.f32 %v3758_v44, %v3886_v9 }
 0x1f1   : > { %v1885_v27 = vadd.f32 %v1884_v34, %v1692_v55  ;;  %2290 = vmatprep.mubr.bf16.mxu1 %v2086_v23  ;;  %v2028_v19 = vmax.f32 %v1883_v3, 0.0  ;;  %v1712_v3 = vadd.f32 %v3805_v16, %v1519_v53 }
 0x1f2   : > { %v1886_v54 = vpop.f32.mrf.mxu0  ;;  %2291 = vmatmul.mubr.bf16.gmra.mxu1 %v2085_v56  ;;  %v3966_v56 = vpop.f32.mrf.mxu1  ;;  %v1718_v44 = vadd.f32 %v3817_v40, %v1525_v15 }
 0x1f3   : > { %v2029_v18 = vmax.f32 %v1885_v27, 0.0  ;;  %v1887_v4 = vadd.f32 %v1886_v54, %v1694_v0  ;;  %v1710_v0 = vadd.f32 %v3799_v2, %v1517_v58  ;;  %v1714_v54 = vadd.f32 %v3811_v25, %v1521_v60 }
 0x1f4   : > { %v1890_v6 = vpop.f32.mrf.mxu0  ;;  %v3973_v38 = vpop.f32.mrf.mxu1  ;;  %v1529_v2 = vadd.f32 %v3764_v47, %v3886_v9  ;;  %v1531_v25 = vadd.f32 %v3770_v51, %v3892_v24 }
 0x1f5   : > { %v2087_v48 = vpack.c.bf16 %v2029_v18, %v2027_v42  ;;  %v2030_v62 = vmax.f32 %v1887_v4, 0.0  ;;  %v1891_v7 = vadd.f32 %v1890_v6, %v1698_v28  ;;  %v1527_v42 = vadd.f32 %v3762_v46, %v3892_v24 }
 0x1f6   : > { %v1892_v21 = vpop.f32.mrf.mxu0  ;;  %v3982_v18 = vpop.f32.mrf.mxu1  ;;  %v1724_v20 = vadd.f32 %v3835_v32, %v1531_v25  ;;  %v4321_v32 = vld [vmem:[#allocation14_spill] sm:$0xff] }
 0x1f7   : > { %v2088_v31 = vpack.c.bf16 %v2030_v62, %v2028_v19  ;;  %v1893_v29 = vadd.f32 %v1892_v21, %v1700_v26  ;;  %v2031_v57 = vmax.f32 %v1891_v7, 0.0  ;;  %v1720_v26 = vadd.f32 %v3823_v49, %v1527_v42 }
 0x1f8   : > { %v1894_v50 = vpop.f32.mrf.mxu0  ;;  %v3989_v46 = vpop.f32.mrf.mxu1  ;;  %v1535_v7 = vadd.f32 %v3772_v52, %v3886_v9  ;;  %v4320_v52 = vld [vmem:[#allocation34_spill] sm:$0xff] }
 0x1f9   : > { %v1895_v35 = vadd.f32 %v1894_v50, %v1702_v5  ;;  %2298 = vmatprep.mubr.bf16.mxu1 %v2088_v31  ;;  %v2032_v23 = vmax.f32 %v1893_v29, 0.0  ;;  %v1722_v5 = vadd.f32 %v3829_v17, %v1529_v2  ;;  %v4319_v17 = vld [vmem:[#allocation13_spill] sm:$0xff] }
 0x1fa   : > { %v1896_v12 = vpop.f32.mrf.mxu0  ;;  %2299 = vmatmul.mubr.bf16.gmra.mxu1 %v2087_v48  ;;  %v1539_v49 = vadd.f32 %v4319_v17, %v3886_v9 }
 0x1fb   : > { %v2033_v13 = vmax.f32 %v1895_v35, 0.0  ;;  %v1897_v8 = vadd.f32 %v1896_v12, %v1704_v11  ;;  %v4318_v11 = vld [vmem:[#allocation12_spill] sm:$0xff]  ;;  %v3998_v35 = vpop.f32.mrf.mxu1 }
 0x1fc   : > { %v1900_v55 = vpop.f32.mrf.mxu0  ;;  %v1537_v29 = vadd.f32 %v4318_v11, %v3892_v24  ;;  %v4330_v11 = vld [vmem:[#allocation49_spill] sm:$0xff] }
 0x1fd   : > { %v2089_v33 = vpack.c.bf16 %v2033_v13, %v2031_v57  ;;  %v2034_v14 = vmax.f32 %v1897_v8, 0.0  ;;  %v1901_v27 = vadd.f32 %v1900_v55, %v1708_v36  ;;  %v1728_v13 = vadd.f32 %v4320_v52, %v1535_v7 }
 0x1fe   : > { %v1902_v34 = vpop.f32.mrf.mxu0  ;;  %v1541_v36 = vadd.f32 %v4321_v32, %v3892_v24 }
 0x1ff   : > { %v2090_v39 = vpack.c.bf16 %v2034_v14, %v2032_v23  ;;  %v1903_v37 = vadd.f32 %v1902_v34, %v1710_v0  ;;  %v2035_v16 = vmax.f32 %v1901_v27, 0.0  ;;  %v4322_v34 = vld [vmem:[#allocation37_spill] sm:$0xff] }
 0x200   : > { %v1904_v63 = vpop.f32.mrf.mxu0  ;;  %v1730_v0 = vadd.f32 %v4322_v34, %v1537_v29  ;;  %v4335_v34 = vld [vmem:[#allocation21_spill] sm:$0xff] }
 0x201   : > { %v1905_v43 = vadd.f32 %v1904_v63, %v1712_v3  ;;  %2306 = vmatprep.mubr.bf16.mxu1 %v2090_v39  ;;  %v2036_v19 = vmax.f32 %v1903_v37, 0.0  ;;  %v4323_v3 = vld [vmem:[#allocation40_spill] sm:$0xff]  ;;  %v4324_v63 = vld [vmem:[#allocation15_spill] sm:$0xff] }
 0x202   : > { %v1906_v4 = vpop.f32.mrf.mxu0  ;;  %2307 = vmatmul.mubr.bf16.gmra.mxu1 %v2089_v33  ;;  %v4005_v33 = vpop.f32.mrf.mxu1  ;;  %v1732_v39 = vadd.f32 %v4323_v3, %v1539_v49 }
 0x203   : > { %v2037_v28 = vmax.f32 %v1905_v43, 0.0  ;;  %v1907_v6 = vadd.f32 %v1906_v4, %v1714_v54  ;;  %v1545_v54 = vadd.f32 %v4324_v63, %v3886_v9  ;;  %v4325_v43 = vld [vmem:[#allocation43_spill] sm:$0xff] }
 0x204   : > { %v1910_v45 = vpop.f32.mrf.mxu0  ;;  %v1734_v42 = vadd.f32 %v4325_v43, %v1541_v36 }
 0x205   : > { %v2091_v48 = vpack.c.bf16 %v2037_v28, %v2035_v16  ;;  %v2038_v62 = vmax.f32 %v1907_v6, 0.0  ;;  %v1911_v31 = vadd.f32 %v1910_v45, %v1718_v44  ;;  %v4326_v16 = vld [vmem:[#allocation16_spill] sm:$0xff]  ;;  %v4014_v6 = vpop.f32.mrf.mxu1  ;;  %v4327_v45 = vld [vmem:[#allocation17_spill] sm:$0xff] }
 0x206   : > { %v1912_v21 = vpop.f32.mrf.mxu0  ;;  %v1547_v28 = vadd.f32 %v4326_v16, %v3892_v24  ;;  %v1549_v25 = vadd.f32 %v4327_v45, %v3886_v9 }
 0x207   : > { %v2092_v47 = vpack.c.bf16 %v2038_v62, %v2036_v19  ;;  %v1913_v50 = vadd.f32 %v1912_v21, %v1720_v26  ;;  %v2039_v12 = vmax.f32 %v1911_v31, 0.0  ;;  %v4328_v21 = vld [vmem:[#allocation46_spill] sm:$0xff] }
 0x208   : > { %v1914_v40 = vpop.f32.mrf.mxu0  ;;  %v1738_v26 = vadd.f32 %v4328_v21, %v1545_v54  ;;  %v1740_v29 = vadd.f32 %v4330_v11, %v1547_v28 }
 0x209   : > { %v1915_v51 = vadd.f32 %v1914_v40, %v1722_v5  ;;  %2314 = vmatprep.mubr.bf16.mxu1 %v2092_v47  ;;  %v2040_v55 = vmax.f32 %v1913_v50, 0.0  ;;  %v4329_v47 = vld [vmem:[#allocation18_spill] sm:$0xff]  ;;  %v4021_v50 = vpop.f32.mrf.mxu1 }
 0x20a   : > { %v1916_v58 = vpop.f32.mrf.mxu0  ;;  %2315 = vmatmul.mubr.bf16.gmra.mxu1 %v2091_v48  ;;  %v1551_v31 = vadd.f32 %v4329_v47, %v3892_v24 }
 0x20b   : > { %v2041_v53 = vmax.f32 %v1915_v51, 0.0  ;;  %v1917_v57 = vadd.f32 %v1916_v58, %v1724_v20  ;;  %v4331_v58 = vld [vmem:[#allocation52_spill] sm:$0xff] }
 0x20c   : > { %v1920_v8 = vpop.f32.mrf.mxu0  ;;  %v1742_v17 = vadd.f32 %v4331_v58, %v1549_v25 }
 0x20d   : > { %v2093_v60 = vpack.c.bf16 %v2041_v53, %v2039_v12  ;;  %v2042_v23 = vmax.f32 %v1917_v57, 0.0  ;;  %v1921_v15 = vadd.f32 %v1920_v8, %v1728_v13  ;;  %v4332_v53 = vld [vmem:[#allocation19_spill] sm:$0xff] }
 0x20e   : > { %v1922_v14 = vpop.f32.mrf.mxu0  ;;  %v1555_v57 = vadd.f32 %v4332_v53, %v3886_v9  ;;  %v4333_v13 = vld [vmem:[#allocation55_spill] sm:$0xff] }
 0x20f   : > { %v2094_v27 = vpack.c.bf16 %v2042_v23, %v2040_v55  ;;  %v1923_v4 = vadd.f32 %v1922_v14, %v1730_v0  ;;  %v2043_v19 = vmax.f32 %v1921_v15, 0.0  ;;  %v1744_v8 = vadd.f32 %v4333_v13, %v1551_v31  ;;  %v4334_v55 = vld [vmem:[#allocation20_spill] sm:$0xff]  ;;  %v4030_v23 = vpop.f32.mrf.mxu1  ;;  %v4336_v15 = vld [vmem:[#allocation58_spill] sm:$0xff] }
 0x210   : > { %v1924_v37 = vpop.f32.mrf.mxu0  ;;  %v1559_v0 = vadd.f32 %v4335_v34, %v3886_v9  ;;  %v1748_v63 = vadd.f32 %v4336_v15, %v1555_v57  ;;  %v4339_v31 = vld [vmem:[#allocation24_spill] sm:$0xff] }
 0x211   : > { %v1925_v2 = vadd.f32 %v1924_v37, %v1732_v39  ;;  %2322 = vmatprep.mubr.bf16.mxu1 %v2094_v27  ;;  %v2044_v7 = vmax.f32 %v1923_v4, 0.0  ;;  %v4337_v37 = vld [vmem:[#allocation22_spill] sm:$0xff]  ;;  %v4037_v16 = vpop.f32.mrf.mxu1 }
 0x212   : > { %v1926_v44 = vpop.f32.mrf.mxu0  ;;  %2323 = vmatmul.mubr.bf16.gmra.mxu1 %v2093_v60  ;;  %v1557_v60 = vadd.f32 %v4334_v55, %v3892_v24  ;;  %v1561_v43 = vadd.f32 %v4337_v37, %v3892_v24  ;;  %v1752_v45 = vadd.f32 %v3918_v10, %v1559_v0 }
 0x213   : > { %v2045_v48 = vmax.f32 %v1925_v2, 0.0  ;;  %v1927_v62 = vadd.f32 %v1926_v44, %v1734_v42 }
 0x214   : > { %v1930_v5 = vpop.f32.mrf.mxu0  ;;  %v1750_v44 = vadd.f32 %v3909_v1, %v1557_v60  ;;  %v4340_v1 = vld [vmem:[#allocation25_spill] sm:$0xff]  ;;  %v4342_v60 = vld [vmem:[#allocation27_spill] sm:$0xff] }
 0x215   : > { %v2095_v40 = vpack.c.bf16 %v2045_v48, %v2043_v19  ;;  %v2046_v20 = vmax.f32 %v1927_v62, 0.0  ;;  %v1931_v12 = vadd.f32 %v1930_v5, %v1738_v26  ;;  %v4338_v48 = vld [vmem:[#allocation23_spill] sm:$0xff]  ;;  %v1754_v26 = vadd.f32 %v3925_v61, %v1561_v43  ;;  %v4341_v61 = vld [vmem:[#allocation26_spill] sm:$0xff] }
 0x216   : > { %v1932_v51 = vpop.f32.mrf.mxu0  ;;  %v1565_v62 = vadd.f32 %v4338_v48, %v3886_v9  ;;  %v1569_v10 = vadd.f32 %v4340_v1, %v3886_v9  ;;  %v4347_v1 = vld [vmem:[#allocation32_spill] sm:$0xff] }
 0x217   : > { %v2096_v49 = vpack.c.bf16 %v2046_v20, %v2044_v7  ;;  %v1933_v32 = vadd.f32 %v1932_v51, %v1740_v29  ;;  %v2047_v3 = vmax.f32 %v1931_v12, 0.0  ;;  %v1567_v7 = vadd.f32 %v4339_v31, %v3892_v24 }
 0x218   : > { %v1934_v52 = vpop.f32.mrf.mxu0  ;;  %v1758_v58 = vadd.f32 %v3934_v41, %v1565_v62 }
 0x219   : > { %v1935_v36 = vadd.f32 %v1934_v52, %v1742_v17  ;;  %2330 = vmatprep.mubr.bf16.mxu1 %v2096_v49  ;;  %v2048_v42 = vmax.f32 %v1933_v32, 0.0  ;;  %v1571_v49 = vadd.f32 %v4341_v61, %v3892_v24  ;;  %v1762_v32 = vadd.f32 %v3950_v59, %v1569_v10 }
 0x21a   : > { %v1936_v14 = vpop.f32.mrf.mxu0  ;;  %2331 = vmatmul.mubr.bf16.gmra.mxu1 %v2095_v40  ;;  %v4046_v40 = vpop.f32.mrf.mxu1  ;;  %v1587_v10 = vadd.f32 %v4347_v1, %v3892_v24 }
 0x21b   : > { %v2049_v39 = vmax.f32 %v1935_v36, 0.0  ;;  %v1937_v27 = vadd.f32 %v1936_v14, %v1744_v8  ;;  %v1760_v8 = vadd.f32 %v3941_v22, %v1567_v7  ;;  %v1575_v14 = vadd.f32 %v4342_v60, %v3886_v9  ;;  %v4344_v22 = vld [vmem:[#allocation29_spill] sm:$0xff] }
 0x21c   : > { %v1940_v54 = vpop.f32.mrf.mxu0  ;;  %v4053_v52 = vpop.f32.mrf.mxu1  ;;  %v1764_v34 = vadd.f32 %v3957_v30, %v1571_v49  ;;  %v1579_v59 = vadd.f32 %v4344_v22, %v3886_v9  ;;  %v4345_v30 = vld [vmem:[#allocation30_spill] sm:$0xff] }
 0x21d   : > { %v2097_v4 = vpack.c.bf16 %v2049_v39, %v2047_v3  ;;  %v2050_v2 = vmax.f32 %v1937_v27, 0.0  ;;  %v1941_v19 = vadd.f32 %v1940_v54, %v1748_v63  ;;  %v4343_v39 = vld [vmem:[#allocation28_spill] sm:$0xff] }
 0x21e   : > { %v1942_v28 = vpop.f32.mrf.mxu0  ;;  %v1577_v27 = vadd.f32 %v4343_v39, %v3892_v24  ;;  %v4062_v15 = vpop.f32.mrf.mxu1  ;;  %v1772_v62 = vadd.f32 %v3982_v18, %v1579_v59 }
 0x21f   : > { %v2098_v25 = vpack.c.bf16 %v2050_v2, %v2048_v42  ;;  %v1943_v5 = vadd.f32 %v1942_v28, %v1750_v44  ;;  %v2051_v51 = vmax.f32 %v1941_v19, 0.0  ;;  %v1768_v42 = vadd.f32 %v3966_v56, %v1575_v14 }
 0x220   : > { %v1944_v21 = vpop.f32.mrf.mxu0  ;;  %v1581_v2 = vadd.f32 %v4345_v30, %v3892_v24  ;;  %v1770_v48 = vadd.f32 %v3973_v38, %v1577_v27  ;;  %v4348_v38 = vld [vmem:[#allocation33_spill] sm:$0xff]  ;;  %v4351_v27 = vld [vmem:[#allocation38_spill] sm:$0xff] }
 0x221   : > { %v1945_v47 = vadd.f32 %v1944_v21, %v1752_v45  ;;  %2338 = vmatprep.mubr.bf16.mxu1 %v2098_v25  ;;  %v2052_v12 = vmax.f32 %v1943_v5, 0.0  ;;  %v4069_v25 = vpop.f32.mrf.mxu1  ;;  %v4346_v5 = vld [vmem:[#allocation31_spill] sm:$0xff]  ;;  %v1589_v18 = vadd.f32 %v4348_v38, %v3886_v9 }
 0x222   : > { %v1946_v20 = vpop.f32.mrf.mxu0  ;;  %2339 = vmatmul.mubr.bf16.gmra.mxu1 %v2097_v4  ;;  %v1774_v31 = vadd.f32 %v3989_v46, %v1581_v2  ;;  %v4349_v46 = vld [vmem:[#allocation35_spill] sm:$0xff] }
 0x223   : > { %v2053_v11 = vmax.f32 %v1945_v47, 0.0  ;;  %v1947_v29 = vadd.f32 %v1946_v20, %v1754_v26  ;;  %v1585_v47 = vadd.f32 %v4346_v5, %v3886_v9  ;;  %v4354_v5 = vld [vmem:[#allocation42_spill] sm:$0xff] }
 0x224   : > { %v1950_v17 = vpop.f32.mrf.mxu0 }
 0x225   : > { %v2099_v53 = vpack.c.bf16 %v2053_v11, %v2051_v51  ;;  %v2054_v57 = vmax.f32 %v1947_v29, 0.0  ;;  %v1951_v55 = vadd.f32 %v1950_v17, %v1758_v58  ;;  %v4078_v51 = vpop.f32.mrf.mxu1  ;;  %v1778_v61 = vadd.f32 %v3998_v35, %v1585_v47 }
 0x226   : > { %v1952_v13 = vpop.f32.mrf.mxu0  ;;  %v1605_v47 = vadd.f32 %v4354_v5, %v3886_v9 }
 0x227   : > { %v2100_v36 = vpack.c.bf16 %v2054_v57, %v2052_v12  ;;  %v1953_v0 = vadd.f32 %v1952_v13, %v1760_v8  ;;  %v2055_v54 = vmax.f32 %v1951_v55, 0.0  ;;  %v1591_v12 = vadd.f32 %v4349_v46, %v3892_v24  ;;  %v1803_v8 = vpop.f32.mrf.mxu1 }
 0x228   : > { %v1954_v41 = vpop.f32.mrf.mxu0  ;;  %v1782_v55 = vadd.f32 %v4014_v6, %v1589_v18 }
 0x229   : > { %v1955_v3 = vadd.f32 %v1954_v41, %v1762_v32  ;;  %2346 = vmatprep.mubr.bf16.mxu1 %v2100_v36  ;;  %v2056_v28 = vmax.f32 %v1953_v0, 0.0  ;;  %v1780_v36 = vadd.f32 %v4005_v33, %v1587_v10  ;;  %v4350_v41 = vld [vmem:[#allocation36_spill] sm:$0xff]  ;;  %v1784_v35 = vadd.f32 %v4021_v50, %v1591_v12  ;;  %v1807_v22 = vpop.f32.mrf.mxu1  ;;  %v4352_v33 = vld [vmem:[#allocation39_spill] sm:$0xff]  ;;  %v4353_v50 = vld [vmem:[#allocation41_spill] sm:$0xff] }
 0x22a   : > { %v1956_v63 = vpop.f32.mrf.mxu0  ;;  %2347 = vmatmul.mubr.bf16.gmra.mxu1 %v2099_v53  ;;  %v1599_v6 = vadd.f32 %v4352_v33, %v3886_v9  ;;  %v1601_v30 = vadd.f32 %v4353_v50, %v3892_v24 }
 0x22b   : > { %v2057_v37 = vmax.f32 %v1955_v3, 0.0  ;;  %v1957_v43 = vadd.f32 %v1956_v63, %v1764_v34  ;;  %v1595_v34 = vadd.f32 %v4350_v41, %v3886_v9  ;;  %v1597_v63 = vadd.f32 %v4351_v27, %v3892_v24 }
 0x22c   : > { %v1960_v4 = vpop.f32.mrf.mxu0 }
 0x22d   : > { %v2101_v44 = vpack.c.bf16 %v2057_v37, %v2055_v54  ;;  %v2058_v45 = vmax.f32 %v1957_v43, 0.0  ;;  %v1961_v26 = vadd.f32 %v1960_v4, %v1768_v42  ;;  %v1788_v42 = vadd.f32 %v4030_v23, %v1595_v34 }
 0x22e   : > { %v1962_v19 = vpop.f32.mrf.mxu0  ;;  %v1794_v23 = vadd.f32 %v4053_v52, %v1601_v30  ;;  %v4357_v52 = vld [vmem:[#allocation47_spill] sm:$0xff] }
 0x22f   : > { %v2102_v21 = vpack.c.bf16 %v2058_v45, %v2056_v28  ;;  %v1963_v7 = vadd.f32 %v1962_v19, %v1770_v48  ;;  %v2059_v29 = vmax.f32 %v1961_v26, 0.0  ;;  %v1809_v45 = vpop.f32.mrf.mxu1  ;;  %v1790_v48 = vadd.f32 %v4037_v16, %v1597_v63  ;;  %v4356_v16 = vld [vmem:[#allocation45_spill] sm:$0xff] }
 0x230   : > { %v1964_v56 = vpop.f32.mrf.mxu0 }
 0x231   : > { %v1965_v20 = vadd.f32 %v1964_v56, %v1772_v62  ;;  %2354 = vmatprep.mubr.bf16.mxu1 %v2102_v21  ;;  %v2060_v53 = vmax.f32 %v1963_v7, 0.0  ;;  %v1792_v62 = vadd.f32 %v4046_v40, %v1599_v6  ;;  %v1811_v10 = vpop.f32.mrf.mxu1  ;;  %v1609_v40 = vadd.f32 %v4356_v16, %v3886_v9 }
 0x232   : > { %v1966_v11 = vpop.f32.mrf.mxu0  ;;  %2355 = vmatmul.mubr.bf16.gmra.mxu1 %v2101_v44 }
 0x233   : > { %v2061_v58 = vmax.f32 %v1965_v20, 0.0  ;;  %v1967_v17 = vadd.f32 %v1966_v11, %v1774_v31  ;;  %v4355_v20 = vld [vmem:[#allocation44_spill] sm:$0xff] }
 0x234   : > { %v1970_v49 = vpop.f32.mrf.mxu0  ;;  %v1607_v1 = vadd.f32 %v4355_v20, %v3892_v24 }
 0x235   : > { %v2103_v57 = vpack.c.bf16 %v2061_v58, %v2059_v29  ;;  %v2062_v13 = vmax.f32 %v1967_v17, 0.0  ;;  %v1971_v14 = vadd.f32 %v1970_v49, %v1778_v61  ;;  %v1798_v58 = vadd.f32 %v4062_v15, %v1605_v47  ;;  %v4363_v47 = vld [vmem:[#allocation56_spill] sm:$0xff] }
 0x236   : > { %v1972_v32 = vpop.f32.mrf.mxu0  ;;  %v1611_v61 = vadd.f32 %v4357_v52, %v3892_v24 }
 0x237   : > { %v2104_v60 = vpack.c.bf16 %v2062_v13, %v2060_v53  ;;  %v1973_v3 = vadd.f32 %v1972_v32, %v1780_v36  ;;  %v2063_v54 = vmax.f32 %v1971_v14, 0.0  ;;  %v1813_v53 = vpop.f32.mrf.mxu1  ;;  %v1800_v13 = vadd.f32 %v4069_v25, %v1607_v1  ;;  %v4360_v25 = vld [vmem:[#allocation51_spill] sm:$0xff] }
 0x238   : > { %v1974_v0 = vpop.f32.mrf.mxu0  ;;  %v1802_v32 = vadd.f32 %v4078_v51, %v1609_v40  ;;  %v1804_v15 = vadd.f32 %v1803_v8, %v1611_v61  ;;  %v1619_v63 = vadd.f32 %v4360_v25, %v3886_v9  ;;  %v4365_v40 = vld [vmem:[#allocation59_spill] sm:$0xff] }
 0x239   : > { %v1975_v39 = vadd.f32 %v1974_v0, %v1782_v55  ;;  %2362 = vmatprep.mubr.bf16.mxu1 %v2104_v60  ;;  %v2064_v2 = vmax.f32 %v1973_v3, 0.0  ;;  %v4358_v60 = vld [vmem:[#allocation48_spill] sm:$0xff] }
 0x23a   : > { %v1976_v59 = vpop.f32.mrf.mxu0  ;;  %2363 = vmatmul.mubr.bf16.gmra.mxu1 %v2103_v57  ;;  %v1615_v14 = vadd.f32 %v4358_v60, %v3886_v9 }
 0x23b   : > { %v2065_v37 = vmax.f32 %v1975_v39, 0.0  ;;  %v1977_v43 = vadd.f32 %v1976_v59, %v1784_v35  ;;  %v4359_v35 = vld [vmem:[#allocation50_spill] sm:$0xff]  ;;  %v1817_v39 = vpop.f32.mrf.mxu1 }
 0x23c   : > { %v1980_v4 = vpop.f32.mrf.mxu0  ;;  %v1617_v3 = vadd.f32 %v4359_v35, %v3892_v24  ;;  %v1808_v6 = vadd.f32 %v1807_v22, %v1615_v14 }
 0x23d   : > { %v2105_v28 = vpack.c.bf16 %v2065_v37, %v2063_v54  ;;  %v2066_v44 = vmax.f32 %v1977_v43, 0.0  ;;  %v1981_v26 = vadd.f32 %v1980_v4, %v1788_v42  ;;  %v4361_v37 = vld [vmem:[#allocation53_spill] sm:$0xff]  ;;  %v1819_v50 = vpop.f32.mrf.mxu1 }
 0x23e   : > { %v1982_v19 = vpop.f32.mrf.mxu0  ;;  %v1621_v8 = vadd.f32 %v4361_v37, %v3892_v24 }
 0x23f   : > { %v2106_v21 = vpack.c.bf16 %v2066_v44, %v2064_v2  ;;  %v1983_v31 = vadd.f32 %v1982_v19, %v1790_v48  ;;  %v2067_v38 = vmax.f32 %v1981_v26, 0.0  ;;  %v1810_v2 = vadd.f32 %v1809_v45, %v1617_v3  ;;  %v4362_v48 = vld [vmem:[#allocation54_spill] sm:$0xff] }
 0x240   : > { %v1984_v56 = vpop.f32.mrf.mxu0  ;;  %v1814_v26 = vadd.f32 %v1813_v53, %v1621_v8 }
 0x241   : > { %v1985_v7 = vadd.f32 %v1984_v56, %v1792_v62  ;;  %2370 = vmatprep.mubr.bf16.mxu1 %v2106_v21  ;;  %v2068_v49 = vmax.f32 %v1983_v31, 0.0  ;;  %v1625_v62 = vadd.f32 %v4362_v48, %v3886_v9  ;;  %v1627_v56 = vadd.f32 %v4363_v47, %v3892_v24 }
 0x242   : > { %v1986_v11 = vpop.f32.mrf.mxu0  ;;  %2371 = vmatmul.mubr.bf16.gmra.mxu1 %v2105_v28  ;;  %v1812_v28 = vadd.f32 %v1811_v10, %v1619_v63 }
 0x243   : > { %v2069_v18 = vmax.f32 %v1985_v7, 0.0  ;;  %v1987_v29 = vadd.f32 %v1986_v11, %v1794_v23  ;;  %v1821_v23 = vpop.f32.mrf.mxu1  ;;  %v4364_v7 = vld [vmem:[#allocation57_spill] sm:$0xff]  ;;  %v1818_v11 = vadd.f32 %v1817_v39, %v1625_v62  ;;  %v1820_v61 = vadd.f32 %v1819_v50, %v1627_v56 }
 0x244   : > { %v1990_v17 = vpop.f32.mrf.mxu0  ;;  %v1629_v45 = vadd.f32 %v4364_v7, %v3886_v9 }
 0x245   : > { %v2107_v46 = vpack.c.bf16 %v2069_v18, %v2067_v38  ;;  %v2070_v12 = vmax.f32 %v1987_v29, 0.0  ;;  %v1991_v55 = vadd.f32 %v1990_v17, %v1798_v58  ;;  %v1631_v38 = vadd.f32 %v4365_v40, %v3892_v24  ;;  %v1823_v17 = vpop.f32.mrf.mxu1 }
 0x246   : > { %v1992_v57 = vpop.f32.mrf.mxu0 }
 0x247   : > { %v2108_v36 = vpack.c.bf16 %v2070_v12, %v2068_v49  ;;  %v1993_v34 = vadd.f32 %v1992_v57, %v1800_v13  ;;  %v2071_v51 = vmax.f32 %v1991_v55, 0.0  ;;  %v1822_v49 = vadd.f32 %v1821_v23, %v1629_v45 }
 0x248   : > { %v1994_v41 = vpop.f32.mrf.mxu0  ;;  %v1824_v57 = vadd.f32 %v1823_v17, %v1631_v38 }
 0x249   : > { %v1995_v0 = vadd.f32 %v1994_v41, %v1802_v32  ;;  %2378 = vmatprep.mubr.bf16.mxu1 %v2108_v36  ;;  %v2072_v43 = vmax.f32 %v1993_v34, 0.0 }
 0x24a   : > { %v1996_v27 = vpop.f32.mrf.mxu0  ;;  %2379 = vmatmul.mubr.bf16.gmra.mxu1 %v2107_v46 }
 0x24b   : > { %v2073_v59 = vmax.f32 %v1995_v0, 0.0  ;;  %v1997_v33 = vadd.f32 %v1996_v27, %v1804_v15  ;;  %v4131_v0 = vld [vmem:[%s4253_s4] ss:$0 sm:$0xff] }
 0x24c   : > { %v2000_v54 = vpop.f32.mrf.mxu0 }
 0x24d   : > { %v2109_v42 = vpack.c.bf16 %v2073_v59, %v2071_v51  ;;  %v2074_v4 = vmax.f32 %v1997_v33, 0.0  ;;  %v2001_v19 = vadd.f32 %v2000_v54, %v1808_v6 }
 0x24e   : > { %v2002_v30 = vpop.f32.mrf.mxu0 }
 0x24f   : > { %v2110_v44 = vpack.c.bf16 %v2074_v4, %v2072_v43  ;;  %v2003_v5 = vadd.f32 %v2002_v30, %v1810_v2  ;;  %v2075_v20 = vmax.f32 %v2001_v19, 0.0 }
 0x250   : > { %v2004_v21 = vpop.f32.mrf.mxu0 }
 0x251   : > { %v2005_v22 = vadd.f32 %v2004_v21, %v1812_v28  ;;  %2386 = vmatprep.mubr.bf16.mxu1 %v2110_v44  ;;  %v2076_v18 = vmax.f32 %v2003_v5, 0.0 }
 0x252   : > { %v2006_v31 = vpop.f32.mrf.mxu0  ;;  %2387 = vmatmul.mubr.bf16.gmra.mxu1 %v2109_v42 }
 0x253   : > { %v2077_v1 = vmax.f32 %v2005_v22, 0.0  ;;  %v2007_v10 = vadd.f32 %v2006_v31, %v1814_v26 }
 0x254   : > { %v2010_v16 = vpop.f32.mrf.mxu0 }
 0x255   : > { %v2111_v29 = vpack.c.bf16 %v2077_v1, %v2075_v20  ;;  %v2078_v58 = vmax.f32 %v2007_v10, 0.0  ;;  %v2011_v12 = vadd.f32 %v2010_v16, %v1818_v11 }
 0x256   : > { %v2012_v52 = vpop.f32.mrf.mxu0 }
 0x257   : > { %v2112_v46 = vpack.c.bf16 %v2078_v58, %v2076_v18  ;;  %v2013_v9 = vadd.f32 %v2012_v52, %v1820_v61  ;;  %v2079_v36 = vmax.f32 %v2011_v12, 0.0 }
 0x258   : > { %v2014_v53 = vpop.f32.mrf.mxu0 }
 0x259   : > { %v2015_v13 = vadd.f32 %v2014_v53, %v1822_v49  ;;  %2394 = vmatprep.mubr.bf16.mxu1 %v2112_v46  ;;  %v2080_v60 = vmax.f32 %v2013_v9, 0.0 }
 0x25a   : > { %v2016_v32 = vpop.f32.mrf.mxu0  ;;  %2395 = vmatmul.mubr.bf16.gmra.mxu1 %v2111_v29 }
 0x25b   : > { %v2081_v55 = vmax.f32 %v2015_v13, 0.0  ;;  %v2017_v24 = vadd.f32 %v2016_v32, %v1824_v57 }
 0x25d   : > { %v2113_v14 = vpack.c.bf16 %v2081_v55, %v2079_v36  ;;  %v2082_v41 = vmax.f32 %v2017_v24, 0.0 }
 0x25f   : > { %v2114_v15 = vpack.c.bf16 %v2082_v41, %v2080_v60 }
 0x261   : > { %2402 = vmatprep.mubr.bf16.mxu1 %v2114_v15 }
 0x262   : > { %2403 = vmatmul.mubr.bf16.gmra.mxu1 %v2113_v14 }
 0x2aa   : > { %v2792_v34 = vpop.f32.mrf.mxu1 }
 0x2ac   : > { %v2793_v35 = vpop.f32.mrf.mxu1 }
 0x2ad   : > { %v2794_v3 = vadd.f32 %v2793_v35, %v2792_v34 }
 0x2ae   : > { %v2795_v39 = vpop.f32.mrf.mxu1 }
 0x2af   : > { %v2285_v27 = vadd.f32 %v2794_v3, %v4131_v0 }
 0x2b0   : > { %v2796_v25 = vpop.f32.mrf.mxu1 }
 0x2b1   : > { %2411 = vst [vmem:[%s4134_s14] sm:$0xff] %v2285_v27  ;;  %v2797_v63 = vadd.f32 %v2796_v25, %v2795_v39 }
 0x2b2   : > { %v2798_v51 = vpop.f32.mrf.mxu1 }
 0x2b3   : > { %v2288_v59 = vadd.f32 %v2797_v63, %v4131_v0 }
 0x2b4   : > { %v2799_v33 = vpop.f32.mrf.mxu1 }
 0x2b5   : > { %2412 = vst [vmem:[%s4134_s14 + $0x8] sm:$0xff] %v2288_v59  ;;  %v2800_v6 = vadd.f32 %v2799_v33, %v2798_v51 }
 0x2b6   : > { %v2801_v54 = vpop.f32.mrf.mxu1 }
 0x2b7   : > { %v2293_v37 = vadd.f32 %v2800_v6, %v4131_v0 }
 0x2b8   : > { %v2802_v8 = vpop.f32.mrf.mxu1 }
 0x2b9   : > { %2413 = vst [vmem:[%s4134_s14 + $0x10] sm:$0xff] %v2293_v37  ;;  %v2803_v43 = vadd.f32 %v2802_v8, %v2801_v54 }
 0x2ba   : > { %v2804_v42 = vpop.f32.mrf.mxu1 }
 0x2bb   : > { %v2296_v4 = vadd.f32 %v2803_v43, %v4131_v0 }
 0x2bc   : > { %v2805_v50 = vpop.f32.mrf.mxu1 }
 0x2bd   : > { %2414 = vst [vmem:[%s4134_s14 + $0x18] sm:$0xff] %v2296_v4  ;;  %v2806_v30 = vadd.f32 %v2805_v50, %v2804_v42 }
 0x2be   : > { %v2807_v2 = vpop.f32.mrf.mxu1 }
 0x2bf   : > { %v2301_v28 = vadd.f32 %v2806_v30, %v4131_v0 }
 0x2c0   : > { %v2808_v44 = vpop.f32.mrf.mxu1 }
 0x2c1   : > { %2415 = vst [vmem:[%s4134_s14 + $0x20] sm:$0xff] %v2301_v28  ;;  %v2809_v19 = vadd.f32 %v2808_v44, %v2807_v2 }
 0x2c2   : > { %v2810_v48 = vpop.f32.mrf.mxu1 }
 0x2c3   : > { %v2304_v62 = vadd.f32 %v2809_v19, %v4131_v0 }
 0x2c4   : > { %v2811_v21 = vpop.f32.mrf.mxu1 }
 0x2c5   : > { %2416 = vst [vmem:[%s4134_s14 + $0x28] sm:$0xff] %v2304_v62  ;;  %v2812_v26 = vadd.f32 %v2811_v21, %v2810_v48 }
 0x2c6   : > { %v2813_v5 = vpop.f32.mrf.mxu1 }
 0x2c7   : > { %v2309_v22 = vadd.f32 %v2812_v26, %v4131_v0 }
 0x2c8   : > { %v2814_v47 = vpop.f32.mrf.mxu1 }
 0x2c9   : > { %2417 = vst [vmem:[%s4134_s14 + $0x30] sm:$0xff] %v2309_v22  ;;  %v2815_v56 = vadd.f32 %v2814_v47, %v2813_v5 }
 0x2ca   : > { %v2816_v23 = vpop.f32.mrf.mxu1 }
 0x2cb   : > { %v2312_v31 = vadd.f32 %v2815_v56, %v4131_v0 }
 0x2cc   : > { %v2817_v7 = vpop.f32.mrf.mxu1 }
 0x2cd   : > { %2418 = vst [vmem:[%s4134_s14 + $0x38] sm:$0xff] %v2312_v31  ;;  %v2818_v45 = vadd.f32 %v2817_v7, %v2816_v23 }
 0x2ce   : > { %v2819_v20 = vpop.f32.mrf.mxu1 }
 0x2cf   : > { %v2317_v1 = vadd.f32 %v2818_v45, %v4131_v0 }
 0x2d0   : > { %v2820_v10 = vpop.f32.mrf.mxu1 }
 0x2d1   : > { %2419 = vst [vmem:[%s4134_s14 + $0x40] sm:$0xff] %v2317_v1  ;;  %v2821_v11 = vadd.f32 %v2820_v10, %v2819_v20 }
 0x2d2   : > { %v2822_v16 = vpop.f32.mrf.mxu1 }
 0x2d3   : > { %v2320_v40 = vadd.f32 %v2821_v11, %v4131_v0 }
 0x2d4   : > { %v2823_v38 = vpop.f32.mrf.mxu1 }
 0x2d5   : > { %2420 = vst [vmem:[%s4134_s14 + $0x48] sm:$0xff] %v2320_v40  ;;  %v2824_v18 = vadd.f32 %v2823_v38, %v2822_v16 }
 0x2d6   : > { %v2825_v29 = vpop.f32.mrf.mxu1 }
 0x2d7   : > { %v2325_v58 = vadd.f32 %v2824_v18, %v4131_v0 }
 0x2d8   : > { %v2826_v17 = vpop.f32.mrf.mxu1 }
 0x2d9   : > { %2421 = vst [vmem:[%s4134_s14 + $0x50] sm:$0xff] %v2325_v58  ;;  %v2827_v52 = vadd.f32 %v2826_v17, %v2825_v29 }
 0x2da   : > { %v2828_v61 = vpop.f32.mrf.mxu1 }
 0x2db   : > { %v2328_v49 = vadd.f32 %v2827_v52, %v4131_v0 }
 0x2dc   : > { %v2829_v46 = vpop.f32.mrf.mxu1 }
 0x2dd   : > { %2422 = vst [vmem:[%s4134_s14 + $0x58] sm:$0xff] %v2328_v49  ;;  %v2830_v12 = vadd.f32 %v2829_v46, %v2828_v61 }
 0x2de   : > { %v2831_v53 = vpop.f32.mrf.mxu1 }
 0x2df   : > { %v2333_v57 = vadd.f32 %v2830_v12, %v4131_v0 }
 0x2e0   : > { %v2832_v9 = vpop.f32.mrf.mxu1 }
 0x2e1   : > { %2423 = vst [vmem:[%s4134_s14 + $0x60] sm:$0xff] %v2333_v57  ;;  %v2833_v13 = vadd.f32 %v2832_v9, %v2831_v53 }
 0x2e2   : > { %v2834_v32 = vpop.f32.mrf.mxu1 }
 0x2e3   : > { %v2336_v36 = vadd.f32 %v2833_v13, %v4131_v0 }
 0x2e4   : > { %v2835_v55 = vpop.f32.mrf.mxu1 }
 0x2e5   : > { %2424 = vst [vmem:[%s4134_s14 + $0x68] sm:$0xff] %v2336_v36  ;;  %v2836_v24 = vadd.f32 %v2835_v55, %v2834_v32 }
 0x2e6   : > { %v2837_v60 = vpop.f32.mrf.mxu1 }
 0x2e7   : > { %v2341_v14 = vadd.f32 %v2836_v24, %v4131_v0 }
 0x2e8   : > { %v2838_v41 = vpop.f32.mrf.mxu1 }
 0x2e9   : > { %2425 = vst [vmem:[%s4134_s14 + $0x70] sm:$0xff] %v2341_v14  ;;  %v2839_v15 = vadd.f32 %v2838_v41, %v2837_v60 }
 0x2ea   : > { %v2840_v34 = vpop.f32.mrf.mxu1 }
 0x2eb   : > { %v2344_v35 = vadd.f32 %v2839_v15, %v4131_v0 }
 0x2ec   : > { %v2841_v3 = vpop.f32.mrf.mxu1 }
 0x2ed   : > { %2426 = vst [vmem:[%s4134_s14 + $0x78] sm:$0xff] %v2344_v35  ;;  %v2842_v39 = vadd.f32 %v2841_v3, %v2840_v34 }
 0x2ee   : > { %v2843_v27 = vpop.f32.mrf.mxu1 }
 0x2ef   : > { %v2349_v25 = vadd.f32 %v2842_v39, %v4131_v0 }
 0x2f0   : > { %v2844_v63 = vpop.f32.mrf.mxu1 }
 0x2f1   : > { %2427 = vst [vmem:[%s4134_s14 + $0x80] sm:$0xff] %v2349_v25  ;;  %v2845_v51 = vadd.f32 %v2844_v63, %v2843_v27 }
 0x2f2   : > { %v2846_v59 = vpop.f32.mrf.mxu1 }
 0x2f3   : > { %v2352_v33 = vadd.f32 %v2845_v51, %v4131_v0 }
 0x2f4   : > { %v2847_v6 = vpop.f32.mrf.mxu1 }
 0x2f5   : > { %2428 = vst [vmem:[%s4134_s14 + $0x88] sm:$0xff] %v2352_v33  ;;  %v2848_v54 = vadd.f32 %v2847_v6, %v2846_v59 }
 0x2f6   : > { %v2849_v37 = vpop.f32.mrf.mxu1 }
 0x2f7   : > { %v2357_v8 = vadd.f32 %v2848_v54, %v4131_v0 }
 0x2f8   : > { %v2850_v43 = vpop.f32.mrf.mxu1 }
 0x2f9   : > { %2429 = vst [vmem:[%s4134_s14 + $0x90] sm:$0xff] %v2357_v8  ;;  %v2851_v42 = vadd.f32 %v2850_v43, %v2849_v37 }
 0x2fa   : > { %v2852_v4 = vpop.f32.mrf.mxu1 }
 0x2fb   : > { %v2360_v50 = vadd.f32 %v2851_v42, %v4131_v0 }
 0x2fc   : > { %v2853_v30 = vpop.f32.mrf.mxu1 }
 0x2fd   : > { %2430 = vst [vmem:[%s4134_s14 + $0x98] sm:$0xff] %v2360_v50  ;;  %v2854_v2 = vadd.f32 %v2853_v30, %v2852_v4 }
 0x2fe   : > { %v2855_v28 = vpop.f32.mrf.mxu1 }
 0x2ff   : > { %v2365_v44 = vadd.f32 %v2854_v2, %v4131_v0 }
 0x300   : > { %v2856_v19 = vpop.f32.mrf.mxu1 }
 0x301   : > { %2431 = vst [vmem:[%s4134_s14 + $0xa0] sm:$0xff] %v2365_v44  ;;  %v2857_v48 = vadd.f32 %v2856_v19, %v2855_v28 }
 0x302   : > { %v2858_v62 = vpop.f32.mrf.mxu1 }
 0x303   : > { %v2368_v21 = vadd.f32 %v2857_v48, %v4131_v0 }
 0x304   : > { %v2859_v26 = vpop.f32.mrf.mxu1 }
 0x305   : > { %2432 = vst [vmem:[%s4134_s14 + $0xa8] sm:$0xff] %v2368_v21  ;;  %v2860_v5 = vadd.f32 %v2859_v26, %v2858_v62 }
 0x306   : > { %v2861_v22 = vpop.f32.mrf.mxu1 }
 0x307   : > { %v2373_v47 = vadd.f32 %v2860_v5, %v4131_v0 }
 0x308   : > { %v2862_v56 = vpop.f32.mrf.mxu1 }
 0x309   : > { %2433 = vst [vmem:[%s4134_s14 + $0xb0] sm:$0xff] %v2373_v47  ;;  %v2863_v23 = vadd.f32 %v2862_v56, %v2861_v22 }
 0x30a   : > { %v2864_v31 = vpop.f32.mrf.mxu1 }
 0x30b   : > { %v2376_v7 = vadd.f32 %v2863_v23, %v4131_v0 }
 0x30c   : > { %v2865_v45 = vpop.f32.mrf.mxu1 }
 0x30d   : > { %2434 = vst [vmem:[%s4134_s14 + $0xb8] sm:$0xff] %v2376_v7  ;;  %v2866_v20 = vadd.f32 %v2865_v45, %v2864_v31 }
 0x30e   : > { %v2867_v1 = vpop.f32.mrf.mxu1 }
 0x30f   : > { %v2381_v10 = vadd.f32 %v2866_v20, %v4131_v0 }
 0x310   : > { %v2868_v11 = vpop.f32.mrf.mxu1 }
 0x311   : > { %2435 = vst [vmem:[%s4134_s14 + $0xc0] sm:$0xff] %v2381_v10  ;;  %v2869_v16 = vadd.f32 %v2868_v11, %v2867_v1 }
 0x312   : > { %v2870_v40 = vpop.f32.mrf.mxu1 }
 0x313   : > { %v2384_v38 = vadd.f32 %v2869_v16, %v4131_v0 }
 0x314   : > { %v2871_v18 = vpop.f32.mrf.mxu1 }
 0x315   : > { %2436 = vst [vmem:[%s4134_s14 + $0xc8] sm:$0xff] %v2384_v38  ;;  %v2872_v29 = vadd.f32 %v2871_v18, %v2870_v40 }
 0x316   : > { %v2873_v58 = vpop.f32.mrf.mxu1 }
 0x317   : > { %v2389_v17 = vadd.f32 %v2872_v29, %v4131_v0 }
 0x318   : > { %v2874_v52 = vpop.f32.mrf.mxu1 }
 0x319   : > { %2437 = vst [vmem:[%s4134_s14 + $0xd0] sm:$0xff] %v2389_v17  ;;  %v2875_v61 = vadd.f32 %v2874_v52, %v2873_v58 }
 0x31a   : > { %v2876_v49 = vpop.f32.mrf.mxu1 }
 0x31b   : > { %v2392_v46 = vadd.f32 %v2875_v61, %v4131_v0 }
 0x31c   : > { %v2877_v12 = vpop.f32.mrf.mxu1 }
 0x31d   : > { %2438 = vst [vmem:[%s4134_s14 + $0xd8] sm:$0xff] %v2392_v46  ;;  %v2878_v53 = vadd.f32 %v2877_v12, %v2876_v49 }
 0x31e   : > { %v2879_v57 = vpop.f32.mrf.mxu1 }
 0x31f   : > { %v2397_v9 = vadd.f32 %v2878_v53, %v4131_v0 }
 0x320   : > { %v2880_v13 = vpop.f32.mrf.mxu1 }
 0x321   : > { %2439 = vst [vmem:[%s4134_s14 + $0xe0] sm:$0xff] %v2397_v9  ;;  %v2881_v32 = vadd.f32 %v2880_v13, %v2879_v57 }
 0x322   : > { %v2882_v36 = vpop.f32.mrf.mxu1 }
 0x323   : > { %v2400_v55 = vadd.f32 %v2881_v32, %v4131_v0 }
 0x324   : > { %v2883_v24 = vpop.f32.mrf.mxu1 }
 0x325   : > { %2440 = vst [vmem:[%s4134_s14 + $0xe8] sm:$0xff] %v2400_v55  ;;  %v2884_v60 = vadd.f32 %v2883_v24, %v2882_v36 }
 0x326   : > { %v2885_v14 = vpop.f32.mrf.mxu1 }
 0x327   : > { %v2405_v41 = vadd.f32 %v2884_v60, %v4131_v0 }
 0x328   : > { %v2886_v15 = vpop.f32.mrf.mxu1 }
 0x329   : > { %2441 = vst [vmem:[%s4134_s14 + $0xf0] sm:$0xff] %v2405_v41  ;;  %v2887_v34 = vadd.f32 %v2886_v15, %v2885_v14 }
 0x32b   : > { %v2408_v35 = vadd.f32 %v2887_v34, %v4131_v0 }
 0x32d   : > { %2442 = vst [vmem:[%s4134_s14 + $0xf8] sm:$0xff] %v2408_v35 }
 0x32e   : > { %3363 = shalt.err (!%p3360_p9)
}
 0x32f   : > { %s3364_s24 = scalar_lea.hbm %s4202_s15, 4096  ;;  %s3368_s11 = scalar_lea.hbm %s4254_s5, 8192 }
 0x330   : > { %p3365_p13 = scmp.ne.s32.totalorder %s4202_s15, %s3364_s24  ;;  %p3369_p4 = scmp.lt.s32.totalorder %s4202_s15, %s4254_s5 }
 0x331   : > { %p3370_p8 = scmp.lt.s32.totalorder %s3368_s11, %s3364_s24 }
 0x332   : > { %p3366_p5 = pnand %p3365_p13, %p4366_p10 }
 0x333   : > { %p3371_p7 = por %p3370_p8, %p3369_p4 }
 0x334   : > { %p3367_p0 = pneg %p3366_p5 }
 0x336   : > { %p3372_p11 = pnand %p3371_p7, %p3367_p0 }
 0x338   : > { %3375 = shalt.err (!%p3372_p11)
}
 0x339   : > { %s3430_s29 = smov 128   ;;  %s3431_s10 = smov 8  }
 0x33a   : > { %2901 = dma.vmem_to_hbm [thread:$0]  (%p4366_p10), %s4204_s7, 4096, %s4202_s15, %s2444_s16, %s3430_s29, %s3430_s29, %s3431_s10  }
 0x33b PF: > { %s2472_s12 = sand.u32 1, %s3406_s18   ;;  %p4367_p1 = scmp.ne.s32.totalorder %s4260_s25, 0 }
 0x33c   : > { %p4368_p2 = scmp.ge.s32.totalorder %s3418_s21, 2  ;;  %s2473_s27 = scalar_lea.sflag [#allocation4], %s2472_s12 }
 0x33e   : > { %p2915_p6 = pnand %p4368_p2, %p4367_p1 }
 0x340   : > { %p2916_p12 = pneg %p2915_p6 }
 0x342   : > { %3401 = dma.done.wait (%p2916_p12), %s2473_s27, 4096  }
 0x343   : > { %3403 = vsyncadd (%p2916_p12), %s2473_s27, 4294963200  ;;  %p19_p3 = scmp.ge.s32.totalorder %s3534_s17, 4   ;;  %s4369_s18 = smov %s3410_s19 }
 0x344   : > { %s4370_s19 = smov %s3414_s20  ;;  %s4371_s20 = smov %s3543_s28 }
 0x345   : > { %s4372_s21 = smov %s3534_s17  ;;  %21 = sbr.rel (!%p19_p3) target bundleno = 6 (0x6), region = 93 }
 0x34a   :  { %2478 = vsyncpa [#allocation3], 1 }
 0x34b   :  { %2480 = vsyncpa [#allocation3 + $0x1], 1 }
 0x34c   :  { %2481 = vsyncpa [#allocation6], 1 }
 0x34d   :  { %2482 = vsyncpa [#allocation4], 1 }
 0x34e   :  { %2484 = vsyncpa [#allocation4 + $0x1], 1 }

</bundles_post_ra>
